<compile_context>
chip_gen: v6e
topology: v6e:2x2x1
jax: 0.10.0
libtpu: 0.0.40
codegen_flags: <defaults>
</compile_context>

<pallas_src>
import functools

import jax
import jax.numpy as jnp
from jax import lax
from jax.experimental import pallas as pl
from jax.experimental.pallas import tpu as pltpu

NUM_CLASSES = 10                 # num_classes arg of CNN(...)
NUM_FTRS = 2048                  # resnet152 fc.in_features
HIDDEN = NUM_CLASSES * 10        # first Linear's logical output width (100)
HIDDEN_PAD = 128                 # lane-aligned padded width (zero padding)


def head_kernel(feat_ref, w1_ref, b1_ref, w2_ref, b2_ref, out_ref, *, batch, hw):
    # feat_ref: [B*HW, C] f32.  Cast to bf16 in-kernel (no standalone XLA cast
    # round-trip through HBM); MXU accumulates in f32.
    feat_bf = feat_ref[...].astype(jnp.bfloat16)

    # Avg-pool + first Linear fused on the MXU.  w1 already carries the 1/HW
    # scale, so  h[b] = sum_hw ( feat[b, hw, :] @ (w1 / HW) ).
    ph = jnp.dot(feat_bf, w1_ref[...],
                 preferred_element_type=jnp.float32)                 # [B*HW, 128]

    # Per-batch sum over the HW rows, done as a tiny f32 MXU dot against a
    # block-diagonal one-hot pooling matrix built from iota (avoids a
    # non-tile-aligned reshape / cross-sublane reduce).
    r = lax.broadcasted_iota(jnp.int32, (batch, batch * hw), 1)
    b = lax.broadcasted_iota(jnp.int32, (batch, batch * hw), 0)
    sel = ((r >= b * hw) & (r < (b + 1) * hw)).astype(jnp.float32)   # [B, B*HW]
    h = jnp.dot(sel, ph, preferred_element_type=jnp.float32) + b1_ref[...]  # [B, 128]

    # Second Linear.  Padded columns of w1/b1 and padded rows of w2 are exactly
    # zero, so the 100->128 padding contributes nothing to the logits.
    logits = jnp.dot(h.astype(w2_ref.dtype), w2_ref[...],
                     preferred_element_type=jnp.float32) + b2_ref[...]      # [B, 10]

    # LogSoftmax(dim=1), numerically stable.
    m = jnp.max(logits, axis=1, keepdims=True)
    z = logits - m
    lse = jnp.log(jnp.sum(jnp.exp(z), axis=1, keepdims=True))
    out_ref[...] = (z - lse).astype(out_ref.dtype)


def prepare_head_params(w1, b1, w2, b2, hw):
    """Static, once-per-model weight prep (hoisted out of the per-call path):
       fold the avg-pool 1/HW scale into w1, zero-pad HIDDEN 100 -> 128 for
       lane alignment, cast the large weights to bf16 (halves their DMA)."""
    c = w1.shape[0]
    w1p = jnp.zeros((c, HIDDEN_PAD), jnp.float32).at[:, :HIDDEN].set(w1 * (1.0 / hw))
    b1p = jnp.zeros((1, HIDDEN_PAD), jnp.float32).at[:, :HIDDEN].set(b1.reshape(1, -1))
    w2p = jnp.zeros((HIDDEN_PAD, NUM_CLASSES), jnp.float32).at[:HIDDEN, :].set(w2)
    b2p = b2.reshape(1, NUM_CLASSES).astype(jnp.float32)
    return w1p.astype(jnp.bfloat16), b1p, w2p.astype(jnp.bfloat16), b2p


def cnn_head(feat, w1_bf, b1p, w2_bf, b2p):
    """feat: [B, HW, C] layer4 feature map (channels-last, f32).
       w1_bf/b1p/w2_bf/b2p: outputs of prepare_head_params (pre-padded, 1/HW
       folded into w1_bf, big weights in bf16)."""
    B, HW, C = feat.shape
    assert C == NUM_FTRS

    # Free row-major reshape: [B, HW, C] -> [B*HW, C] (lane-dense, only 98->104
    # sublane padding inside the kernel instead of per-batch 49->56/64).
    feat2d = feat.reshape(B * HW, C)

    kernel = functools.partial(head_kernel, batch=B, hw=HW)

    return pl.pallas_call(
        kernel,
        out_shape=jax.ShapeDtypeStruct((B, NUM_CLASSES), jnp.float32),
        grid_spec=pl.GridSpec(
            grid=(1,),   # ~1.3 MB of operands: single block fits VMEM everywhere
            in_specs=[
                pl.BlockSpec((B * HW, C), lambda i: (0, 0)),
                pl.BlockSpec((C, HIDDEN_PAD), lambda i: (0, 0)),
                pl.BlockSpec((1, HIDDEN_PAD), lambda i: (0, 0)),
                pl.BlockSpec((HIDDEN_PAD, NUM_CLASSES), lambda i: (0, 0)),
                pl.BlockSpec((1, NUM_CLASSES), lambda i: (0, 0)),
            ],
            out_specs=pl.BlockSpec((B, NUM_CLASSES), lambda i: (0, 0)),
        ),
        compiler_params=pltpu.CompilerParams(
            dimension_semantics=("arbitrary",),
        ),
    )(feat2d, w1_bf, b1p, w2_bf, b2p)


def reference(feat, w1, b1, w2, b2):
    # Pure-f32 reference matching the original module head semantics.
    pooled = jnp.mean(feat, axis=1)
    h = pooled @ w1 + b1
    logits = h @ w2 + b2
    return jax.nn.log_softmax(logits, axis=1)


if __name__ == "__main__":
    key = jax.random.PRNGKey(0)
    k_feat, k_w1, k_b1, k_w2, k_b2 = jax.random.split(key, 5)

    B, HW = 2, 7 * 7   # batch=2, resnet152 layer4 spatial 7x7
    feat = jax.random.normal(k_feat, (B, HW, NUM_FTRS), dtype=jnp.float32)

    # Deterministic parameter init (synthetic; shapes from the module's __init__).
    w1 = jax.random.normal(k_w1, (NUM_FTRS, HIDDEN), dtype=jnp.float32) * 0.02
    b1 = jax.random.normal(k_b1, (HIDDEN,), dtype=jnp.float32) * 0.01
    w2 = jax.random.normal(k_w2, (HIDDEN, NUM_CLASSES), dtype=jnp.float32) * 0.02
    b2 = jax.random.normal(k_b2, (NUM_CLASSES,), dtype=jnp.float32) * 0.01

    # Weight prep happens ONCE here, not inside the per-call path.
    params = prepare_head_params(w1, b1, w2, b2, HW)

    out = cnn_head(feat, *params)
    out = jax.block_until_ready(out)

    ref = reference(feat, w1, b1, w2, b2)
    assert out.shape == (B, NUM_CLASSES)
    # bf16 feat/w1/w2 with f32 accumulation keeps log-prob error well below
    # 1e-2 at these magnitudes.
    assert jnp.allclose(out, ref, atol=1e-2, rtol=1e-2)

    print("KERNEL_OK")
</pallas_src>

<mosaic_0001>
module attributes {stable_mosaic.version = 11 : i64} {
  func.func @head_kernel(%arg0: i32, %arg1: memref<98x2048xf32, #tpu.memory_space<vmem>>, %arg2: memref<2048x128xbf16, #tpu.memory_space<vmem>>, %arg3: memref<1x128xf32, #tpu.memory_space<vmem>>, %arg4: memref<128x10xbf16, #tpu.memory_space<vmem>>, %arg5: memref<1x10xf32, #tpu.memory_space<vmem>>, %arg6: memref<2x10xf32, #tpu.memory_space<vmem>>) attributes {dimension_semantics = [#tpu.dimension_semantics<arbitrary>], iteration_bounds = array<i64: 1>, scalar_prefetch = 0 : i64, scratch_operands = 0 : i64, tpu.core_type = #tpu.core_type<tc>, window_params = [{pipeline_mode = #tpu.pipeline_mode<synchronous>, transform_indices = @transform_0, window_bounds = array<i64: 98, 2048>}, {pipeline_mode = #tpu.pipeline_mode<synchronous>, transform_indices = @transform_1, window_bounds = array<i64: 2048, 128>}, {pipeline_mode = #tpu.pipeline_mode<synchronous>, transform_indices = @transform_2, window_bounds = array<i64: 1, 128>}, {pipeline_mode = #tpu.pipeline_mode<synchronous>, transform_indices = @transform_3, window_bounds = array<i64: 128, 10>}, {pipeline_mode = #tpu.pipeline_mode<synchronous>, transform_indices = @transform_4, window_bounds = array<i64: 1, 10>}, {pipeline_mode = #tpu.pipeline_mode<synchronous>, transform_indices = @transform_5, window_bounds = array<i64: 2, 10>}]} {
    %c0 = arith.constant 0 : index
    %c0_0 = arith.constant 0 : index
    %0 = vector.load %arg1[%c0, %c0_0] : memref<98x2048xf32, #tpu.memory_space<vmem>>, vector<98x2048xf32>
    %1 = arith.truncf %0 : vector<98x2048xf32> to vector<98x2048xbf16>
    %c0_1 = arith.constant 0 : index
    %c0_2 = arith.constant 0 : index
    %2 = vector.load %arg2[%c0_1, %c0_2] : memref<2048x128xbf16, #tpu.memory_space<vmem>>, vector<2048x128xbf16>
    %cst = arith.constant dense<0.000000e+00> : vector<98x128xf32>
    %3 = tpu.matmul %1, %2, %cst {dimension_numbers = #tpu.dot_dimension_numbers<[1], [0], [0], [1], [0, 0, 1, 1], [], []>} : vector<98x2048xbf16>, vector<2048x128xbf16>, vector<98x128xf32> -> vector<98x128xf32>
    %4 = tpu.iota {dimensions = array<i32: 1>} : vector<2x98xi32>
    %5 = tpu.iota {dimensions = array<i32: 0>} : vector<2x98xi32>
    %c49_i32 = arith.constant 49 : i32
    %6 = vector.broadcast %c49_i32 : i32 to vector<2x98xi32>
    %7 = arith.muli %5, %6 : vector<2x98xi32>
    %8 = arith.cmpi sge, %4, %7 : vector<2x98xi32>
    %c1_i32 = arith.constant 1 : i32
    %9 = vector.broadcast %c1_i32 : i32 to vector<2x98xi32>
    %10 = arith.addi %5, %9 : vector<2x98xi32>
    %c49_i32_3 = arith.constant 49 : i32
    %11 = vector.broadcast %c49_i32_3 : i32 to vector<2x98xi32>
    %12 = arith.muli %10, %11 : vector<2x98xi32>
    %13 = arith.cmpi slt, %4, %12 : vector<2x98xi32>
    %14 = arith.andi %8, %13 : vector<2x98xi1>
    %15 = arith.extui %14 : vector<2x98xi1> to vector<2x98xi32>
    %16 = arith.sitofp %15 : vector<2x98xi32> to vector<2x98xf32>
    %cst_4 = arith.constant dense<0.000000e+00> : vector<2x128xf32>
    %17 = tpu.matmul %16, %3, %cst_4 {dimension_numbers = #tpu.dot_dimension_numbers<[1], [0], [0], [1], [0, 0, 1, 1], [], []>} : vector<2x98xf32>, vector<98x128xf32>, vector<2x128xf32> -> vector<2x128xf32>
    %c0_5 = arith.constant 0 : index
    %c0_6 = arith.constant 0 : index
    %18 = vector.load %arg3[%c0_5, %c0_6] : memref<1x128xf32, #tpu.memory_space<vmem>>, vector<1x128xf32>
    %19 = vector.broadcast %18 : vector<1x128xf32> to vector<2x128xf32>
    %20 = arith.addf %17, %19 : vector<2x128xf32>
    %21 = arith.truncf %20 : vector<2x128xf32> to vector<2x128xbf16>
    %c0_7 = arith.constant 0 : index
    %c0_8 = arith.constant 0 : index
    %22 = vector.load %arg4[%c0_7, %c0_8] : memref<128x10xbf16, #tpu.memory_space<vmem>>, vector<128x10xbf16>
    %cst_9 = arith.constant dense<0.000000e+00> : vector<2x10xf32>
    %23 = tpu.matmul %21, %22, %cst_9 {dimension_numbers = #tpu.dot_dimension_numbers<[1], [0], [0], [1], [0, 0, 1, 1], [], []>} : vector<2x128xbf16>, vector<128x10xbf16>, vector<2x10xf32> -> vector<2x10xf32>
    %c0_10 = arith.constant 0 : index
    %c0_11 = arith.constant 0 : index
    %24 = vector.load %arg5[%c0_10, %c0_11] : memref<1x10xf32, #tpu.memory_space<vmem>>, vector<1x10xf32>
    %25 = vector.broadcast %24 : vector<1x10xf32> to vector<2x10xf32>
    %26 = arith.addf %23, %25 : vector<2x10xf32>
    %cst_12 = arith.constant dense<0xFF800000> : vector<2xf32>
    %27 = vector.multi_reduction <maximumf>, %26, %cst_12 [1] : vector<2x10xf32> to vector<2xf32>
    %28 = vector.shape_cast %27 : vector<2xf32> to vector<2x1xf32>
    %29 = vector.broadcast %28 : vector<2x1xf32> to vector<2x10xf32>
    %30 = arith.subf %26, %29 : vector<2x10xf32>
    %31 = math.exp %30 : vector<2x10xf32>
    %cst_13 = arith.constant dense<0.000000e+00> : vector<2xf32>
    %32 = vector.multi_reduction <add>, %31, %cst_13 [1] : vector<2x10xf32> to vector<2xf32>
    %33 = vector.shape_cast %32 : vector<2xf32> to vector<2x1xf32>
    %34 = math.log %33 : vector<2x1xf32>
    %35 = vector.broadcast %34 : vector<2x1xf32> to vector<2x10xf32>
    %36 = arith.subf %30, %35 : vector<2x10xf32>
    %c0_14 = arith.constant 0 : index
    %c0_15 = arith.constant 0 : index
    %37 = vector.load %arg6[%c0_14, %c0_15] : memref<2x10xf32, #tpu.memory_space<vmem>>, vector<2x10xf32>
    tpu.vector_store %arg6[%c0_14, %c0_15], %36 {strides = array<i32>} : memref<2x10xf32, #tpu.memory_space<vmem>>, vector<2x10xf32>,
    return
  }
  func.func @transform_0(%arg0: i32) -> (i32, i32) {
    %c0_i32 = arith.constant 0 : i32
    %c0_i32_0 = arith.constant 0 : i32
    %c0_i32_1 = arith.constant 0 : i32
    return %c0_i32, %c0_i32_0 : i32, i32
  }
  func.func @transform_1(%arg0: i32) -> (i32, i32) {
    %c0_i32 = arith.constant 0 : i32
    %c0_i32_0 = arith.constant 0 : i32
    %c0_i32_1 = arith.constant 0 : i32
    return %c0_i32, %c0_i32_0 : i32, i32
  }
  func.func @transform_2(%arg0: i32) -> (i32, i32) {
    %c0_i32 = arith.constant 0 : i32
    %c0_i32_0 = arith.constant 0 : i32
    %c0_i32_1 = arith.constant 0 : i32
    return %c0_i32, %c0_i32_0 : i32, i32
  }
  func.func @transform_3(%arg0: i32) -> (i32, i32) {
    %c0_i32 = arith.constant 0 : i32
    %c0_i32_0 = arith.constant 0 : i32
    %c0_i32_1 = arith.constant 0 : i32
    return %c0_i32, %c0_i32_0 : i32, i32
  }
  func.func @transform_4(%arg0: i32) -> (i32, i32) {
    %c0_i32 = arith.constant 0 : i32
    %c0_i32_0 = arith.constant 0 : i32
    %c0_i32_1 = arith.constant 0 : i32
    return %c0_i32, %c0_i32_0 : i32, i32
  }
  func.func @transform_5(%arg0: i32) -> (i32, i32) {
    %c0_i32 = arith.constant 0 : i32
    %c0_i32_0 = arith.constant 0 : i32
    %c0_i32_1 = arith.constant 0 : i32
    return %c0_i32, %c0_i32_0 : i32, i32
  }
}

</mosaic_0001>

<bundles_post_ra>
// kernel: tpu_custom_call.1
= control target key start
LH: loop header
LB: loop body
LE: loop exit
PB: predicated region body
PF: predicated region fallthrough
CT: control target
= control target key end

     0   :  { %10 = vsyncpa [#allocation3], 0  ;;  %s3526_s0 = inlined_call_operand.hbm [shape: f32[98,2048], index: 0, kind: input, shape index: {}]   ;;  %s3527_s1 = inlined_call_operand.hbm [shape: bf16[2048,128], index: 1, kind: input, shape index: {}]   ;;  %s3528_s2 = inlined_call_operand.vmem [shape: f32[1,128], index: 2, kind: input, shape index: {}]   ;;  %s3529_s3 = inlined_call_operand.vmem [shape: bf16[128,10], index: 3, kind: input, shape index: {}]   ;;  %s3530_s4 = inlined_call_operand.vmem [shape: f32[1,10], index: 4, kind: input, shape index: {}]   ;;  %s3531_s5 = inlined_call_operand.hbm [shape: f32[2,10], index: 5, kind: output, shape index: {}]  }
   0x1   :  { %11 = vsyncpa [#allocation6], 0 }
   0x2   :  { %12 = vsyncpa [#allocation4], 0  ;;  %s3229_s18 = smov [#allocation2]  }
   0x3   :  { %s18_s19 = sshll.u32 %s3229_s18, 4  ;;  %s19_s19 = int_to_ptr.vmem [resolvable:$true] %s18_s19 }
   0x4   :  { %s3171_s20 = scalar_lea.vmem %s19_s19, 26624  ;;  %p3176_p1 = scmp.lt.s32.totalorder %s19_s19, %s19_s19 }
   0x5   :  { %p3172_p0 = scmp.ne.s32.totalorder %s19_s19, %s3171_s20  ;;  %p3177_p2 = scmp.lt.s32.totalorder %s3171_s20, %s3171_s20 }
   0x7   :  { %p3178_p3 = por %p3177_p2, %p3176_p1 }
   0x9   :  { %p3179_p4 = pnand %p3178_p3, %p3172_p0 }
   0xb   :  { %3182 = shalt.err (!%p3179_p4)
}
   0xc   :  { %s3230_s21 = smov 2048   ;;  %s3231_s22 = smov 128  }
   0xd   :  { %24 = dma.hbm_to_vmem [thread:$0]  %s3526_s0, 26624, %s19_s19, [#allocation3], %s3230_s21, %s3230_s21, %s3231_s22  }
   0xe   :  { %s3232_s25 = smov [#allocation5]  }
   0xf   :  { %s30_s26 = sshll.u32 %s3232_s25, 4  ;;  %s31_s26 = int_to_ptr.vmem [resolvable:$true] %s30_s26 }
  0x10   :  { %s3191_s27 = scalar_lea.vmem %s31_s26, 16384  ;;  %p3196_p6 = scmp.lt.s32.totalorder %s31_s26, %s31_s26 }
  0x11   :  { %p3192_p5 = scmp.ne.s32.totalorder %s31_s26, %s3191_s27  ;;  %p3197_p7 = scmp.lt.s32.totalorder %s3191_s27, %s3191_s27 }
  0x13   :  { %p3198_p8 = por %p3197_p7, %p3196_p6 }
  0x15   :  { %p3199_p9 = pnand %p3198_p8, %p3192_p5 }
  0x17   :  { %3202 = shalt.err (!%p3199_p9)
}
  0x18   :  { %s3233_s28 = smov 64   ;;  %s3234_s29 = smov 4  }
  0x19   :  { %36 = dma.hbm_to_vmem [thread:$0]  %s3527_s1, 16384, %s31_s26, [#allocation6], %s3233_s28, %s3233_s28, %s3234_s29  }
  0x1a   :  { %3223 = dma.done.wait [#allocation3], 26624  }
  0x1b   :  { %3224 = vsyncadd [#allocation3], 4294940672 }
  0x1c   :  { %3225 = dma.done.wait [#allocation6], 16384  }
  0x1d   :  { %3226 = vsyncadd [#allocation6], 4294950912  ;;  %v3023_v0 = vld [vmem:[#allocation5 + $0x78] sm:$0xff]   ;;  %v3027_v4 = vld [vmem:[#allocation5 + $0x70] sm:$0xff]   ;;  %vm3236_vm0 = vmmov 0   ;;  %vm2121_vm1 = vcmask 1041408  }
  0x1e   :  { %v3024_v1 = vld [vmem:[#allocation5 + $0xf8] sm:$0xff]   ;;  %2478 = vmatprep.subr.bf16.mxu0 %v3023_v0  ;;  %v3028_v5 = vld [vmem:[#allocation5 + $0xf0] sm:$0xff]   ;;  %v3031_v8 = vld [vmem:[#allocation5 + $0x68] sm:$0xff]   ;;  %vm2117_vm5 = vcmask 801792   ;;  %vm2307_vm6 = vcmask 74752  }
  0x1f   :  { %v3025_v2 = vld [vmem:[#allocation5 + $0x38] sm:$0xff]   ;;  %2536 = vmatprep.subr.bf16.mxu1 %v3024_v1  ;;  %v3029_v6 = vld [vmem:[#allocation5 + $0x30] sm:$0xff]   ;;  %v3032_v9 = vld [vmem:[#allocation5 + $0xe8] sm:$0xff]  }
  0x20   :  { %v3026_v3 = vld [vmem:[#allocation5 + $0xb8] sm:$0xff]   ;;  %2479 = vmatpush3.bf16.msra.mxu0 %v3025_v2  ;;  %v3030_v7 = vld [vmem:[#allocation5 + $0xb0] sm:$0xff]   ;;  %v3033_v10 = vld [vmem:[#allocation5 + $0x28] sm:$0xff]  }
  0x21   :  { %2537 = vmatpush3.bf16.msra.mxu1 %v3026_v3  ;;  %2480 = vmatprep.subr.bf16.mxu0 %v3027_v4  ;;  %v3034_v11 = vld [vmem:[#allocation5 + $0xa8] sm:$0xff]   ;;  %v3035_v12 = vld [vmem:[#allocation5 + $0x60] sm:$0xff]   ;;  %v3039_v16 = vld [vmem:[#allocation5 + $0x58] sm:$0xff]  }
  0x22   :  { %2538 = vmatprep.subr.bf16.mxu1 %v3028_v5  ;;  %v3036_v13 = vld [vmem:[#allocation5 + $0xe0] sm:$0xff]   ;;  %v3040_v17 = vld [vmem:[#allocation5 + $0xd8] sm:$0xff]   ;;  %v3043_v20 = vld [vmem:[#allocation5 + $0x50] sm:$0xff]  }
  0x23   :  { %v3037_v14 = vld [vmem:[#allocation5 + $0x20] sm:$0xff]   ;;  %v3041_v18 = vld [vmem:[#allocation5 + $0x18] sm:$0xff]   ;;  %v3044_v21 = vld [vmem:[#allocation5 + $0xd0] sm:$0xff]  }
  0x24   :  { %2481 = vmatpush3.bf16.msra.mxu0 %v3029_v6  ;;  %v3038_v15 = vld [vmem:[#allocation5 + $0xa0] sm:$0xff]   ;;  %v3042_v19 = vld [vmem:[#allocation5 + $0x98] sm:$0xff]   ;;  %v3045_v22 = vld [vmem:[#allocation5 + $0x10] sm:$0xff]  }
  0x25   :  { %2539 = vmatpush3.bf16.msra.mxu1 %v3030_v7  ;;  %2482 = vmatprep.subr.bf16.mxu0 %v3031_v8  ;;  %v3046_v23 = vld [vmem:[#allocation5 + $0x90] sm:$0xff]   ;;  %v3047_v24 = vld [vmem:[#allocation5 + $0x48] sm:$0xff]   ;;  %v3051_v28 = vld [vmem:[#allocation5 + $0x40] sm:$0xff]  }
  0x26   :  { %2540 = vmatprep.subr.bf16.mxu1 %v3032_v9  ;;  %v3048_v25 = vld [vmem:[#allocation5 + $0xc8] sm:$0xff]   ;;  %v3052_v29 = vld [vmem:[#allocation5 + $0xc0] sm:$0xff]   ;;  %v53_v34 = vld [vmem:[#allocation2 + $0x18] sm:$0xff] }
  0x27   :  { %v3049_v26 = vld [vmem:[#allocation5 + $0x8] sm:$0xff]   ;;  %v3053_v30 = vld [vmem:[#allocation5] sm:$0xff]   ;;  %v69_v36 = vld [vmem:[#allocation2 + $0x98] sm:$0xff] }
  0x28   :  { %2483 = vmatpush3.bf16.msra.mxu0 %v3033_v10  ;;  %v3050_v27 = vld [vmem:[#allocation5 + $0x88] sm:$0xff]   ;;  %v3054_v31 = vld [vmem:[#allocation5 + $0x80] sm:$0xff]   ;;  %v261_v39 = vpack.c.bf16 %v69_v36, %v53_v34  ;;  %v52_v41 = vld [vmem:[#allocation2 + $0x10] sm:$0xff] }
  0x29   :  { %2541 = vmatpush3.bf16.msra.mxu1 %v3034_v11  ;;  %2484 = vmatprep.subr.bf16.mxu0 %v3035_v12  ;;  %v51_v32 = vld [vmem:[#allocation2 + $0x8] sm:$0xff]  ;;  %v50_v37 = vld [vmem:[#allocation2] sm:$0xff]  ;;  %v68_v42 = vld [vmem:[#allocation2 + $0x90] sm:$0xff] }
  0x2a   :  { %2542 = vmatprep.subr.bf16.mxu1 %v3036_v13  ;;  %v67_v33 = vld [vmem:[#allocation2 + $0x88] sm:$0xff]  ;;  %v66_v38 = vld [vmem:[#allocation2 + $0x80] sm:$0xff]  ;;  %v260_v44 = vpack.c.bf16 %v68_v42, %v52_v41  ;;  %v85_v46 = vld [vmem:[#allocation2 + $0x118] sm:$0xff]  ;;  %1514 = vmatprep.mubr.bf16.mxu1 %v261_v39 }
  0x2b   :  { %v259_v35 = vpack.c.bf16 %v67_v33, %v51_v32  ;;  %v258_v40 = vpack.c.bf16 %v66_v38, %v50_v37  ;;  %v83_v43 = vld [vmem:[#allocation2 + $0x108] sm:$0xff]  ;;  %v101_v47 = vld [vmem:[#allocation2 + $0x198] sm:$0xff]  ;;  %v82_v50 = vld [vmem:[#allocation2 + $0x100] sm:$0xff] }
  0x2c   :  { %2485 = vmatpush3.bf16.msra.mxu0 %v3037_v14  ;;  %v99_v45 = vld [vmem:[#allocation2 + $0x188] sm:$0xff]  ;;  %v277_v49 = vpack.c.bf16 %v101_v47, %v85_v46  ;;  %v98_v51 = vld [vmem:[#allocation2 + $0x180] sm:$0xff]  ;;  %v84_v52 = vld [vmem:[#allocation2 + $0x110] sm:$0xff] }
  0x2d   :  { %2543 = vmatpush3.bf16.msra.mxu1 %v3038_v15  ;;  %2486 = vmatprep.subr.bf16.mxu0 %v3039_v16  ;;  %v275_v48 = vpack.c.bf16 %v99_v45, %v83_v43  ;;  %v100_v53 = vld [vmem:[#allocation2 + $0x190] sm:$0xff]  ;;  %v115_v54 = vld [vmem:[#allocation2 + $0x208] sm:$0xff]  ;;  %v117_v56 = vld [vmem:[#allocation2 + $0x218] sm:$0xff]  ;;  %v274_v58 = vpack.c.bf16 %v98_v51, %v82_v50 }
  0x2e   :  { %2544 = vmatprep.subr.bf16.mxu1 %v3040_v17  ;;  %1426 = vmatprep.mubr.bf16.mxu0 %v259_v35  ;;  %v131_v55 = vld [vmem:[#allocation2 + $0x288] sm:$0xff]  ;;  %v133_v57 = vld [vmem:[#allocation2 + $0x298] sm:$0xff]  ;;  %v276_v59 = vpack.c.bf16 %v100_v53, %v84_v52  ;;  %v114_v62 = vld [vmem:[#allocation2 + $0x200] sm:$0xff] }
  0x2f   :  { %v291_v60 = vpack.c.bf16 %v131_v55, %v115_v54  ;;  %v293_v61 = vpack.c.bf16 %v133_v57, %v117_v56  ;;  %v130_v63 = vld [vmem:[#allocation2 + $0x280] sm:$0xff]  ;;  %v3055_v0 = vld [vmem:[#allocation5 + $0x178] sm:$0xff]   ;;  %v116_v1 = vld [vmem:[#allocation2 + $0x210] sm:$0xff] }
  0x30   :  { %2487 = vmatpush3.bf16.msra.mxu0 %v3041_v18  ;;  %v132_v2 = vld [vmem:[#allocation2 + $0x290] sm:$0xff]  ;;  %v147_v3 = vld [vmem:[#allocation2 + $0x308] sm:$0xff]  ;;  %v3056_v5 = vld [vmem:[#allocation5 + $0x1f8] sm:$0xff]   ;;  %v290_v11 = vpack.c.bf16 %v130_v63, %v114_v62 }
  0x31   :  { %2545 = vmatpush3.bf16.msra.mxu1 %v3042_v19  ;;  %2488 = vmatprep.subr.bf16.mxu0 %v3043_v20  ;;  %v163_v4 = vld [vmem:[#allocation2 + $0x388] sm:$0xff]  ;;  %v149_v6 = vld [vmem:[#allocation2 + $0x318] sm:$0xff]  ;;  %v3059_v10 = vld [vmem:[#allocation5 + $0x170] sm:$0xff]   ;;  %v292_v13 = vpack.c.bf16 %v132_v2, %v116_v1 }
  0x32   :  { %2546 = vmatprep.subr.bf16.mxu1 %v3044_v21  ;;  %v165_v7 = vld [vmem:[#allocation2 + $0x398] sm:$0xff]  ;;  %v3060_v12 = vld [vmem:[#allocation5 + $0x1f0] sm:$0xff]   ;;  %v307_v14 = vpack.c.bf16 %v163_v4, %v147_v3  ;;  %v146_v18 = vld [vmem:[#allocation2 + $0x300] sm:$0xff] }
  0x33   :  { %v3057_v8 = vld [vmem:[#allocation5 + $0x138] sm:$0xff]   ;;  %v3061_v15 = vld [vmem:[#allocation5 + $0x130] sm:$0xff]   ;;  %v309_v16 = vpack.c.bf16 %v165_v7, %v149_v6  ;;  %v162_v19 = vld [vmem:[#allocation2 + $0x380] sm:$0xff] }
  0x34   :  { %2489 = vmatpush3.bf16.msra.mxu0 %v3045_v22  ;;  %v3058_v9 = vld [vmem:[#allocation5 + $0x1b8] sm:$0xff]   ;;  %v3062_v17 = vld [vmem:[#allocation5 + $0x1b0] sm:$0xff]   ;;  %v179_v22 = vld [vmem:[#allocation2 + $0x408] sm:$0xff] }
  0x35   :  { %2547 = vmatpush3.bf16.msra.mxu1 %v3046_v23  ;;  %2490 = vmatprep.subr.bf16.mxu0 %v3047_v24  ;;  %v148_v20 = vld [vmem:[#allocation2 + $0x310] sm:$0xff]  ;;  %v195_v23 = vld [vmem:[#allocation2 + $0x488] sm:$0xff]  ;;  %v181_v24 = vld [vmem:[#allocation2 + $0x418] sm:$0xff] }
  0x36   :  { %2548 = vmatprep.subr.bf16.mxu1 %v3048_v25  ;;  %v164_v21 = vld [vmem:[#allocation2 + $0x390] sm:$0xff]  ;;  %v197_v25 = vld [vmem:[#allocation2 + $0x498] sm:$0xff]  ;;  %v3066_v32 = vld [vmem:[#allocation5 + $0x1a8] sm:$0xff]  }
  0x37   :  { %v325_v33 = vpack.c.bf16 %v197_v25, %v181_v24  ;;  %v3067_v34 = vld [vmem:[#allocation5 + $0x160] sm:$0xff]   ;;  %v180_v39 = vld [vmem:[#allocation2 + $0x410] sm:$0xff]  ;;  %v211_v42 = vld [vmem:[#allocation2 + $0x508] sm:$0xff] }
  0x38   :  { %2491 = vmatpush3.bf16.msra.mxu0 %v3049_v26  ;;  %v3063_v26 = vld [vmem:[#allocation5 + $0x168] sm:$0xff]   ;;  %v178_v35 = vld [vmem:[#allocation2 + $0x400] sm:$0xff]  ;;  %v196_v41 = vld [vmem:[#allocation2 + $0x490] sm:$0xff] }
  0x39   :  { %2549 = vmatpush3.bf16.msra.mxu1 %v3050_v27  ;;  %2492 = vmatprep.subr.bf16.mxu0 %v3051_v28  ;;  %v3064_v27 = vld [vmem:[#allocation5 + $0x1e8] sm:$0xff]   ;;  %v306_v28 = vpack.c.bf16 %v162_v19, %v146_v18  ;;  %v3068_v36 = vld [vmem:[#allocation5 + $0x1e0] sm:$0xff]   ;;  %v229_v45 = vld [vmem:[#allocation2 + $0x598] sm:$0xff] }
  0x3a   :  { %2550 = vmatprep.subr.bf16.mxu1 %v3052_v29  ;;  %v3065_v29 = vld [vmem:[#allocation5 + $0x128] sm:$0xff]   ;;  %v3069_v37 = vld [vmem:[#allocation5 + $0x120] sm:$0xff]   ;;  %v3071_v47 = vld [vmem:[#allocation5 + $0x158] sm:$0xff]  }
  0x3b   :  { %v194_v38 = vld [vmem:[#allocation2 + $0x480] sm:$0xff]  ;;  %v227_v43 = vld [vmem:[#allocation2 + $0x588] sm:$0xff]  ;;  %v3072_v50 = vld [vmem:[#allocation5 + $0x1d8] sm:$0xff]  }
  0x3c   :  { %2493 = vmatpush3.bf16.msra.mxu0 %v3053_v30  ;;  %v308_v30 = vpack.c.bf16 %v164_v21, %v148_v20  ;;  %v322_v46 = vpack.c.bf16 %v194_v38, %v178_v35  ;;  %v3073_v52 = vld [vmem:[#allocation5 + $0x118] sm:$0xff]   ;;  %v210_v53 = vld [vmem:[#allocation2 + $0x500] sm:$0xff]  ;;  %v212_v56 = vld [vmem:[#allocation2 + $0x510] sm:$0xff] }
  0x3d   :  { %2551 = vmatpush3.bf16.msra.mxu1 %v3054_v31  ;;  %2594 = vmatprep.subr.bf16.mxu0 %v3055_v0  ;;  %v323_v31 = vpack.c.bf16 %v195_v23, %v179_v22  ;;  %v226_v54 = vld [vmem:[#allocation2 + $0x580] sm:$0xff]  ;;  %v3074_v55 = vld [vmem:[#allocation5 + $0x198] sm:$0xff]   ;;  %v228_v57 = vld [vmem:[#allocation2 + $0x590] sm:$0xff] }
  0x3e   :  { %2652 = vmatprep.subr.bf16.mxu1 %v3056_v5  ;;  %v338_v62 = vpack.c.bf16 %v226_v54, %v210_v53  ;;  %v243_v63 = vld [vmem:[#allocation2 + $0x608] sm:$0x3]  ;;  %v245_v0 = vld [vmem:[#allocation2 + $0x618] sm:$0x3]  ;;  %v340_v1 = vpack.c.bf16 %v228_v57, %v212_v56  ;;  %v242_v5 = vld [vmem:[#allocation2 + $0x600] sm:$0x3] }
  0x3f   :  { %1427 = vmatmul.mubr.bf16.vlgmr.msra.gmra.mxu0 %v258_v40  ;;  %v3070_v40 = vld [vmem:[#allocation5 + $0x1a0] sm:$0xff]   ;;  %v355_v2 = vpack.c.bf16 %v243_v63, %v243_v63  ;;  %v357_v3 = vpack.c.bf16 %v245_v0, %v245_v0  ;;  %v3079_v4 = vld [vmem:[#allocation5 + $0x148] sm:$0xff]   ;;  %v244_v7 = vld [vmem:[#allocation2 + $0x610] sm:$0x3] }
  0x40   :  { %1515 = vmatmul.mubr.bf16.vlgmr.msra.gmra.mxu1 %v260_v44  ;;  %1434 = vmatprep.mubr.bf16.mxu0 %v275_v48  ;;  %v213_v44 = vld [vmem:[#allocation2 + $0x518] sm:$0xff]  ;;  %v324_v48 = vpack.c.bf16 %v196_v41, %v180_v39  ;;  %v3080_v6 = vld [vmem:[#allocation5 + $0x1c8] sm:$0xff]   ;;  %v54_v22 = vld [vmem:[#allocation2 + $0x20] sm:$0xff] }
  0x41   :  { %1522 = vmatprep.mubr.bf16.mxu1 %v277_v49  ;;  %2595 = vmatpush3.bf16.msra.mxu0 %v3057_v8  ;;  %v339_v49 = vpack.c.bf16 %v227_v43, %v211_v42  ;;  %v341_v51 = vpack.c.bf16 %v229_v45, %v213_v44  ;;  %v3081_v8 = vld [vmem:[#allocation5 + $0x108] sm:$0xff]   ;;  %v57_v19 = vld [vmem:[#allocation2 + $0x38] sm:$0xff]  ;;  %v70_v23 = vld [vmem:[#allocation2 + $0xa0] sm:$0xff] }
  0x42   :  { %2653 = vmatpush3.bf16.msra.mxu1 %v3058_v9  ;;  %2596 = vmatprep.subr.bf16.mxu0 %v3059_v10  ;;  %v3082_v9 = vld [vmem:[#allocation5 + $0x188] sm:$0xff]   ;;  %v3083_v10 = vld [vmem:[#allocation5 + $0x140] sm:$0xff]   ;;  %v73_v20 = vld [vmem:[#allocation2 + $0xb8] sm:$0xff] }
  0x43   :  { %2654 = vmatprep.subr.bf16.mxu1 %v3060_v12  ;;  %v354_v12 = vpack.c.bf16 %v242_v5, %v242_v5  ;;  %v265_v21 = vpack.c.bf16 %v73_v20, %v57_v19  ;;  %v56_v24 = vld [vmem:[#allocation2 + $0x30] sm:$0xff]  ;;  %v102_v35 = vld [vmem:[#allocation2 + $0x1a0] sm:$0xff]  ;;  %v119_v38 = vld [vmem:[#allocation2 + $0x228] sm:$0xff] }
  0x44   :  { %v72_v25 = vld [vmem:[#allocation2 + $0xb0] sm:$0xff]  ;;  %v135_v39 = vld [vmem:[#allocation2 + $0x2a8] sm:$0xff]  ;;  %v121_v41 = vld [vmem:[#allocation2 + $0x238] sm:$0xff] }
  0x45   :  { %2597 = vmatpush3.bf16.msra.mxu0 %v3061_v15  ;;  %v3086_v15 = vld [vmem:[#allocation5 + $0x180] sm:$0xff]   ;;  %v137_v42 = vld [vmem:[#allocation2 + $0x2b8] sm:$0xff]  ;;  %v3094_v53 = vld [vmem:[#allocation5 + $0x2b0] sm:$0xff]  }
  0x46   :  { %2655 = vmatpush3.bf16.msra.mxu1 %v3062_v17  ;;  %2598 = vmatprep.subr.bf16.mxu0 %v3063_v26  ;;  %v71_v17 = vld [vmem:[#allocation2 + $0xa8] sm:$0xff]  ;;  %v3088_v43 = vld [vmem:[#allocation5 + $0x2f8] sm:$0xff]   ;;  %v118_v54 = vld [vmem:[#allocation2 + $0x220] sm:$0xff] }
  0x47   :  { %1435 = vmatmul.mubr.bf16.gmra.mxu0 %v274_v58  ;;  %2656 = vmatprep.subr.bf16.mxu1 %v3064_v27  ;;  %v3075_v58 = vld [vmem:[#allocation5 + $0x150] sm:$0xff]   ;;  %v87_v26 = vld [vmem:[#allocation2 + $0x128] sm:$0xff]  ;;  %v3089_v44 = vld [vmem:[#allocation5 + $0x238] sm:$0xff]  }
  0x48   :  { %1523 = vmatmul.mubr.bf16.gmra.mxu1 %v276_v59  ;;  %1442 = vmatprep.mubr.bf16.mxu0 %v291_v60  ;;  %v3076_v59 = vld [vmem:[#allocation5 + $0x1d0] sm:$0xff]   ;;  %v103_v27 = vld [vmem:[#allocation2 + $0x1a8] sm:$0xff]  ;;  %v3090_v45 = vld [vmem:[#allocation5 + $0x2b8] sm:$0xff]  }
  0x49   :  { %1530 = vmatprep.mubr.bf16.mxu1 %v293_v61  ;;  %2599 = vmatpush3.bf16.msra.mxu0 %v3065_v29  ;;  %v3077_v60 = vld [vmem:[#allocation5 + $0x110] sm:$0xff]   ;;  %v105_v29 = vld [vmem:[#allocation2 + $0x1b8] sm:$0xff]  ;;  %v3096_v0 = vld [vmem:[#allocation5 + $0x2e8] sm:$0xff]  }
  0x4a   :  { %2657 = vmatpush3.bf16.msra.mxu1 %v3066_v32  ;;  %2600 = vmatprep.subr.bf16.mxu0 %v3067_v34  ;;  %v3078_v61 = vld [vmem:[#allocation5 + $0x190] sm:$0xff]   ;;  %v279_v32 = vpack.c.bf16 %v103_v27, %v87_v26  ;;  %v86_v34 = vld [vmem:[#allocation2 + $0x120] sm:$0xff]  ;;  %v3098_v5 = vld [vmem:[#allocation5 + $0x2a8] sm:$0xff]  }
  0x4b   :  { %2658 = vmatprep.subr.bf16.mxu1 %v3068_v36  ;;  %v88_v36 = vld [vmem:[#allocation2 + $0x130] sm:$0xff] }
  0x4c   :  { %v120_v56 = vld [vmem:[#allocation2 + $0x230] sm:$0xff] }
  0x4d   :  { %2601 = vmatpush3.bf16.msra.mxu0 %v3069_v37  ;;  %v104_v37 = vld [vmem:[#allocation2 + $0x1b0] sm:$0xff] }
  0x4e   :  { %2659 = vmatpush3.bf16.msra.mxu1 %v3070_v40  ;;  %2602 = vmatprep.subr.bf16.mxu0 %v3071_v47  ;;  %v3087_v40 = vld [vmem:[#allocation5 + $0x278] sm:$0xff]   ;;  %v3091_v47 = vld [vmem:[#allocation5 + $0x270] sm:$0xff]  }
  0x4f   :  { %1443 = vmatmul.mubr.bf16.gmra.mxu0 %v290_v11  ;;  %2660 = vmatprep.subr.bf16.mxu1 %v3072_v50  ;;  %v3084_v11 = vld [vmem:[#allocation5 + $0x1c0] sm:$0xff]   ;;  %v3092_v50 = vld [vmem:[#allocation5 + $0x2f0] sm:$0xff]  }
  0x50   :  { %1531 = vmatmul.mubr.bf16.gmra.mxu1 %v292_v13  ;;  %1450 = vmatprep.mubr.bf16.mxu0 %v307_v14  ;;  %v3085_v13 = vld [vmem:[#allocation5 + $0x100] sm:$0xff]   ;;  %v356_v14 = vpack.c.bf16 %v244_v7, %v244_v7  ;;  %v136_v57 = vld [vmem:[#allocation2 + $0x2b0] sm:$0xff] }
  0x51   :  { %1538 = vmatprep.mubr.bf16.mxu1 %v309_v16  ;;  %2603 = vmatpush3.bf16.msra.mxu0 %v3073_v52  ;;  %v55_v16 = vld [vmem:[#allocation2 + $0x28] sm:$0xff]  ;;  %v3093_v52 = vld [vmem:[#allocation5 + $0x230] sm:$0xff]   ;;  %v166_v7 = vld [vmem:[#allocation2 + $0x3a0] sm:$0xff] }
  0x52   :  { %2661 = vmatpush3.bf16.msra.mxu1 %v3074_v55  ;;  %2604 = vmatprep.subr.bf16.mxu0 %v3075_v58  ;;  %v263_v18 = vpack.c.bf16 %v71_v17, %v55_v16  ;;  %v134_v55 = vld [vmem:[#allocation2 + $0x2a0] sm:$0xff]  ;;  %v151_v58 = vld [vmem:[#allocation2 + $0x328] sm:$0xff]  ;;  %v185_v16 = vld [vmem:[#allocation2 + $0x438] sm:$0xff] }
  0x53   :  { %2662 = vmatprep.subr.bf16.mxu1 %v3076_v59  ;;  %v167_v59 = vld [vmem:[#allocation2 + $0x3a8] sm:$0xff]  ;;  %v294_v63 = vpack.c.bf16 %v134_v55, %v118_v54  ;;  %v201_v17 = vld [vmem:[#allocation2 + $0x4b8] sm:$0xff]  ;;  %v184_v26 = vld [vmem:[#allocation2 + $0x430] sm:$0xff] }
  0x54   :  { %v200_v27 = vld [vmem:[#allocation2 + $0x4b0] sm:$0xff]  ;;  %v3116_v54 = vld [vmem:[#allocation5 + $0x2c0] sm:$0xff]  }
  0x55   :  { %2605 = vmatpush3.bf16.msra.mxu0 %v3077_v60  ;;  %v153_v60 = vld [vmem:[#allocation2 + $0x338] sm:$0xff] }
  0x56   :  { %2663 = vmatpush3.bf16.msra.mxu1 %v3078_v61  ;;  %2606 = vmatprep.subr.bf16.mxu0 %v3079_v4  ;;  %v169_v61 = vld [vmem:[#allocation2 + $0x3b8] sm:$0xff] }
  0x57   :  { %1451 = vmatmul.mubr.bf16.gmra.mxu0 %v306_v28  ;;  %2664 = vmatprep.subr.bf16.mxu1 %v3080_v6  ;;  %v89_v28 = vld [vmem:[#allocation2 + $0x138] sm:$0xff]  ;;  %v313_v4 = vpack.c.bf16 %v169_v61, %v153_v60  ;;  %v150_v6 = vld [vmem:[#allocation2 + $0x320] sm:$0xff]  ;;  %v248_v61 = vld [vmem:[#allocation2 + $0x630] sm:$0x3] }
  0x58   :  { %1539 = vmatmul.mubr.bf16.gmra.mxu1 %v308_v30  ;;  %1458 = vmatprep.mubr.bf16.mxu0 %v323_v31  ;;  %v262_v30 = vpack.c.bf16 %v70_v23, %v54_v22  ;;  %v264_v31 = vpack.c.bf16 %v72_v25, %v56_v24  ;;  %v3103_v22 = vld [vmem:[#allocation5 + $0x258] sm:$0xff]   ;;  %v182_v23 = vld [vmem:[#allocation2 + $0x420] sm:$0xff] }
  0x59   :  { %1546 = vmatprep.mubr.bf16.mxu1 %v325_v33  ;;  %2607 = vmatpush3.bf16.msra.mxu0 %v3081_v8  ;;  %v281_v33 = vpack.c.bf16 %v105_v29, %v89_v28  ;;  %v3099_v8 = vld [vmem:[#allocation5 + $0x260] sm:$0xff]   ;;  %v3104_v25 = vld [vmem:[#allocation5 + $0x2d8] sm:$0xff]   ;;  %v215_v28 = vld [vmem:[#allocation2 + $0x528] sm:$0xff] }
  0x5a   :  { %2665 = vmatpush3.bf16.msra.mxu1 %v3082_v9  ;;  %2608 = vmatprep.subr.bf16.mxu0 %v3083_v10  ;;  %v152_v9 = vld [vmem:[#allocation2 + $0x330] sm:$0xff]  ;;  %v198_v24 = vld [vmem:[#allocation2 + $0x4a0] sm:$0xff]  ;;  %v231_v29 = vld [vmem:[#allocation2 + $0x5a8] sm:$0xff] }
  0x5b   :  { %2666 = vmatprep.subr.bf16.mxu1 %v3084_v11  ;;  %v168_v10 = vld [vmem:[#allocation2 + $0x3b0] sm:$0xff]  ;;  %v183_v11 = vld [vmem:[#allocation2 + $0x428] sm:$0xff]  ;;  %v246_v60 = vld [vmem:[#allocation2 + $0x620] sm:$0x3] }
  0x5c   :  { %v312_v19 = vpack.c.bf16 %v168_v10, %v152_v9  ;;  %v76_v9 = vld [vmem:[#allocation2 + $0xd0] sm:$0xff]  ;;  %v91_v10 = vld [vmem:[#allocation2 + $0x148] sm:$0xff] }
  0x5d   :  { %2609 = vmatpush3.bf16.msra.mxu0 %v3085_v13  ;;  %v3101_v13 = vld [vmem:[#allocation5 + $0x220] sm:$0xff]  }
  0x5e   :  { %2667 = vmatpush3.bf16.msra.mxu1 %v3086_v15  ;;  %2710 = vmatprep.subr.bf16.mxu0 %v3087_v40  ;;  %v3102_v15 = vld [vmem:[#allocation5 + $0x2a0] sm:$0xff]   ;;  %v3110_v40 = vld [vmem:[#allocation5 + $0x290] sm:$0xff]  }
  0x5f   :  { %1459 = vmatmul.mubr.bf16.gmra.mxu0 %v322_v46  ;;  %2768 = vmatprep.subr.bf16.mxu1 %v3088_v43  ;;  %v278_v46 = vpack.c.bf16 %v102_v35, %v86_v34  ;;  %v3107_v34 = vld [vmem:[#allocation5 + $0x250] sm:$0xff]   ;;  %v230_v43 = vld [vmem:[#allocation2 + $0x5a0] sm:$0xff] }
  0x60   :  { %1547 = vmatmul.mubr.bf16.gmra.mxu1 %v324_v48  ;;  %1466 = vmatprep.mubr.bf16.mxu0 %v339_v49  ;;  %v280_v48 = vpack.c.bf16 %v104_v37, %v88_v36  ;;  %v295_v49 = vpack.c.bf16 %v135_v39, %v119_v38  ;;  %v3108_v35 = vld [vmem:[#allocation5 + $0x2d0] sm:$0xff]   ;;  %v326_v36 = vpack.c.bf16 %v198_v24, %v182_v23 }
  0x61   :  { %1554 = vmatprep.mubr.bf16.mxu1 %v341_v51  ;;  %v297_v51 = vpack.c.bf16 %v137_v42, %v121_v41  ;;  %v3109_v37 = vld [vmem:[#allocation5 + $0x210] sm:$0xff]   ;;  %v328_v38 = vpack.c.bf16 %v200_v27, %v184_v26  ;;  %v343_v39 = vpack.c.bf16 %v231_v29, %v215_v28  ;;  %v214_v42 = vld [vmem:[#allocation2 + $0x520] sm:$0xff]  ;;  %v123_v28 = vld [vmem:[#allocation2 + $0x248] sm:$0xff] }
  0x62   :  { %v3123_v23 = vld [vmem:[#allocation5 + $0x370] sm:$0xff]   ;;  %v139_v29 = vld [vmem:[#allocation2 + $0x2c8] sm:$0xff] }
  0x63   :  { %v3124_v24 = vld [vmem:[#allocation5 + $0x3f0] sm:$0xff]  }
  0x64   :  { %v92_v26 = vld [vmem:[#allocation2 + $0x150] sm:$0xff] }
  0x65   :  { %v108_v27 = vld [vmem:[#allocation2 + $0x1d0] sm:$0xff] }
  0x67   :  { %1467 = vmatmul.mubr.bf16.gmra.mxu0 %v338_v62  ;;  %v3095_v62 = vld [vmem:[#allocation5 + $0x268] sm:$0xff]  }
  0x68   :  { %1555 = vmatmul.mubr.bf16.gmra.mxu1 %v340_v1  ;;  %1474 = vmatprep.mubr.bf16.mxu0 %v355_v2  ;;  %v296_v1 = vpack.c.bf16 %v136_v57, %v120_v56  ;;  %v311_v2 = vpack.c.bf16 %v167_v59, %v151_v58  ;;  %v3117_v57 = vld [vmem:[#allocation5 + $0x200] sm:$0xff]  }
  0x69   :  { %1562 = vmatprep.mubr.bf16.mxu1 %v357_v3  ;;  %v3097_v3 = vld [vmem:[#allocation5 + $0x228] sm:$0xff]   ;;  %v3118_v59 = vld [vmem:[#allocation5 + $0x280] sm:$0xff]  }
  0x6f   :  { %1475 = vmatmul.mubr.bf16.gmra.mxu0 %v354_v12  ;;  %v3100_v12 = vld [vmem:[#allocation5 + $0x2e0] sm:$0xff]  }
  0x70   :  { %1563 = vmatmul.mubr.bf16.gmra.mxu1 %v356_v14  ;;  %1602 = vmatprep.mubr.bf16.mxu0 %v263_v18  ;;  %v199_v14 = vld [vmem:[#allocation2 + $0x4a8] sm:$0xff]  ;;  %v310_v18 = vpack.c.bf16 %v166_v7, %v150_v6  ;;  %v58_v6 = vld [vmem:[#allocation2 + $0x40] sm:$0xff] }
  0x71   :  { %1690 = vmatprep.mubr.bf16.mxu1 %v265_v21  ;;  %v327_v20 = vpack.c.bf16 %v199_v14, %v183_v11  ;;  %v329_v21 = vpack.c.bf16 %v201_v17, %v185_v16  ;;  %v74_v7 = vld [vmem:[#allocation2 + $0xc0] sm:$0xff]  ;;  %v107_v11 = vld [vmem:[#allocation2 + $0x1c8] sm:$0xff]  ;;  %v3119_v14 = vld [vmem:[#allocation5 + $0x378] sm:$0xff]  }
  0x72   :  { %v266_v16 = vpack.c.bf16 %v74_v7, %v58_v6  ;;  %v3139_v6 = vld [vmem:[#allocation5 + $0x350] sm:$0xff]  }
  0x77   :  { %1603 = vmatmul.mubr.bf16.vlgmr.msra.gmra.mxu0 %v262_v30  ;;  %v3105_v30 = vld [vmem:[#allocation5 + $0x218] sm:$0xff]  }
  0x78   :  { %1691 = vmatmul.mubr.bf16.vlgmr.msra.gmra.mxu1 %v264_v31  ;;  %1610 = vmatprep.mubr.bf16.mxu0 %v279_v32  ;;  %v217_v31 = vld [vmem:[#allocation2 + $0x538] sm:$0xff] }
  0x79   :  { %1698 = vmatprep.mubr.bf16.mxu1 %v281_v33  ;;  %2711 = vmatpush3.bf16.msra.mxu0 %v3089_v44  ;;  %v233_v32 = vld [vmem:[#allocation2 + $0x5b8] sm:$0xff]  ;;  %v3111_v44 = vld [vmem:[#allocation5 + $0x248] sm:$0xff]  }
  0x7a   :  { %2769 = vmatpush3.bf16.msra.mxu1 %v3090_v45  ;;  %2712 = vmatprep.subr.bf16.mxu0 %v3091_v47  ;;  %v3106_v33 = vld [vmem:[#allocation5 + $0x298] sm:$0xff]   ;;  %v345_v41 = vpack.c.bf16 %v233_v32, %v217_v31  ;;  %v216_v45 = vld [vmem:[#allocation2 + $0x530] sm:$0xff]  ;;  %v247_v47 = vld [vmem:[#allocation2 + $0x628] sm:$0x3] }
  0x7b   :  { %2770 = vmatprep.subr.bf16.mxu1 %v3092_v50  ;;  %v3113_v50 = vld [vmem:[#allocation5 + $0x208] sm:$0xff]   ;;  %v359_v56 = vpack.c.bf16 %v247_v47, %v247_v47  ;;  %v125_v31 = vld [vmem:[#allocation2 + $0x258] sm:$0xff] }
  0x7c   :  { %v141_v32 = vld [vmem:[#allocation2 + $0x2d8] sm:$0xff]  ;;  %v171_v47 = vld [vmem:[#allocation2 + $0x3c8] sm:$0xff] }
  0x7d   :  { %2713 = vmatpush3.bf16.msra.mxu0 %v3093_v52  ;;  %v3115_v52 = vld [vmem:[#allocation5 + $0x240] sm:$0xff]  }
  0x7e   :  { %2771 = vmatpush3.bf16.msra.mxu1 %v3094_v53  ;;  %2714 = vmatprep.subr.bf16.mxu0 %v3095_v62  ;;  %v342_v53 = vpack.c.bf16 %v230_v43, %v214_v42  ;;  %v59_v62 = vld [vmem:[#allocation2 + $0x48] sm:$0xff]  ;;  %v138_v42 = vld [vmem:[#allocation2 + $0x2c0] sm:$0xff] }
  0x7f   :  { %1611 = vmatmul.mubr.bf16.gmra.mxu0 %v278_v46  ;;  %2772 = vmatprep.subr.bf16.mxu1 %v3096_v0  ;;  %v232_v46 = vld [vmem:[#allocation2 + $0x5b0] sm:$0xff]  ;;  %v61_v0 = vld [vmem:[#allocation2 + $0x58] sm:$0xff]  ;;  %v3130_v43 = vld [vmem:[#allocation5 + $0x3a8] sm:$0xff]  }
  0x80   :  { %1699 = vmatmul.mubr.bf16.gmra.mxu1 %v280_v48  ;;  %1618 = vmatprep.mubr.bf16.mxu0 %v295_v49  ;;  %v3112_v48 = vld [vmem:[#allocation5 + $0x2c8] sm:$0xff]   ;;  %v249_v49 = vld [vmem:[#allocation2 + $0x638] sm:$0x3]  ;;  %v344_v55 = vpack.c.bf16 %v232_v46, %v216_v45  ;;  %v140_v45 = vld [vmem:[#allocation2 + $0x2d0] sm:$0xff] }
  0x81   :  { %1706 = vmatprep.mubr.bf16.mxu1 %v297_v51  ;;  %2715 = vmatpush3.bf16.msra.mxu0 %v3097_v3  ;;  %v3114_v51 = vld [vmem:[#allocation5 + $0x288] sm:$0xff]   ;;  %v361_v58 = vpack.c.bf16 %v249_v49, %v249_v49  ;;  %v360_v3 = vpack.c.bf16 %v248_v61, %v248_v61  ;;  %v157_v49 = vld [vmem:[#allocation2 + $0x358] sm:$0xff]  ;;  %v156_v61 = vld [vmem:[#allocation2 + $0x350] sm:$0xff] }
  0x82   :  { %2773 = vmatpush3.bf16.msra.mxu1 %v3098_v5  ;;  %2716 = vmatprep.subr.bf16.mxu0 %v3099_v8  ;;  %v60_v8 = vld [vmem:[#allocation2 + $0x50] sm:$0xff]  ;;  %v155_v46 = vld [vmem:[#allocation2 + $0x348] sm:$0xff] }
  0x83   :  { %2774 = vmatprep.subr.bf16.mxu1 %v3100_v12  ;;  %v93_v12 = vld [vmem:[#allocation2 + $0x158] sm:$0xff]  ;;  %v268_v17 = vpack.c.bf16 %v76_v9, %v60_v8  ;;  %v3140_v8 = vld [vmem:[#allocation5 + $0x3d0] sm:$0xff]  }
  0x85   :  { %2717 = vmatpush3.bf16.msra.mxu0 %v3101_v13  ;;  %v109_v13 = vld [vmem:[#allocation2 + $0x1d8] sm:$0xff] }
  0x86   :  { %2775 = vmatpush3.bf16.msra.mxu1 %v3102_v15  ;;  %2718 = vmatprep.subr.bf16.mxu0 %v3103_v22  ;;  %v3120_v15 = vld [vmem:[#allocation5 + $0x3f8] sm:$0xff]   ;;  %v90_v22 = vld [vmem:[#allocation2 + $0x140] sm:$0xff] }
  0x87   :  { %1619 = vmatmul.mubr.bf16.gmra.mxu0 %v294_v63  ;;  %2776 = vmatprep.subr.bf16.mxu1 %v3104_v25  ;;  %v75_v63 = vld [vmem:[#allocation2 + $0xc8] sm:$0xff]  ;;  %v106_v25 = vld [vmem:[#allocation2 + $0x1c0] sm:$0xff] }
  0x88   :  { %1707 = vmatmul.mubr.bf16.gmra.mxu1 %v296_v1  ;;  %1626 = vmatprep.mubr.bf16.mxu0 %v311_v2  ;;  %v77_v1 = vld [vmem:[#allocation2 + $0xd8] sm:$0xff]  ;;  %v358_v2 = vpack.c.bf16 %v246_v60, %v246_v60 }
  0x89   :  { %1714 = vmatprep.mubr.bf16.mxu1 %v313_v4  ;;  %2719 = vmatpush3.bf16.msra.mxu0 %v3105_v30  ;;  %v267_v4 = vpack.c.bf16 %v75_v63, %v59_v62  ;;  %v269_v5 = vpack.c.bf16 %v77_v1, %v61_v0  ;;  %v3125_v30 = vld [vmem:[#allocation5 + $0x330] sm:$0xff]   ;;  %v3135_v60 = vld [vmem:[#allocation5 + $0x358] sm:$0xff]   ;;  %v187_v63 = vld [vmem:[#allocation2 + $0x448] sm:$0xff] }
  0x8a   :  { %2777 = vmatpush3.bf16.msra.mxu1 %v3106_v33  ;;  %2720 = vmatprep.subr.bf16.mxu0 %v3107_v34  ;;  %v3126_v33 = vld [vmem:[#allocation5 + $0x3b0] sm:$0xff]   ;;  %v282_v34 = vpack.c.bf16 %v106_v25, %v90_v22  ;;  %v203_v0 = vld [vmem:[#allocation2 + $0x4c8] sm:$0xff]  ;;  %v3136_v1 = vld [vmem:[#allocation5 + $0x3d8] sm:$0xff]  }
  0x8b   :  { %2778 = vmatprep.subr.bf16.mxu1 %v3108_v35  ;;  %v3127_v35 = vld [vmem:[#allocation5 + $0x368] sm:$0xff]   ;;  %v172_v62 = vld [vmem:[#allocation2 + $0x3d0] sm:$0xff]  ;;  %v237_v22 = vld [vmem:[#allocation2 + $0x5d8] sm:$0xff] }
  0x8c   :  { %v316_v9 = vpack.c.bf16 %v172_v62, %v156_v61  ;;  %v3146_v25 = vld [vmem:[#allocation5 + $0x388] sm:$0xff]   ;;  %v113_v61 = vld [vmem:[#allocation2 + $0x1f8] sm:$0xff] }
  0x8d   :  { %2721 = vmatpush3.bf16.msra.mxu0 %v3109_v37  ;;  %v299_v37 = vpack.c.bf16 %v139_v29, %v123_v28 }
  0x8e   :  { %2779 = vmatpush3.bf16.msra.mxu1 %v3110_v40  ;;  %2722 = vmatprep.subr.bf16.mxu0 %v3111_v44  ;;  %v3129_v40 = vld [vmem:[#allocation5 + $0x328] sm:$0xff]   ;;  %v124_v44 = vld [vmem:[#allocation2 + $0x250] sm:$0xff] }
  0x8f   :  { %1627 = vmatmul.mubr.bf16.gmra.mxu0 %v310_v18  ;;  %2780 = vmatprep.subr.bf16.mxu1 %v3112_v48  ;;  %v283_v18 = vpack.c.bf16 %v107_v11, %v91_v10  ;;  %v3131_v48 = vld [vmem:[#allocation5 + $0x360] sm:$0xff]   ;;  %v331_v10 = vpack.c.bf16 %v203_v0, %v187_v63  ;;  %v3141_v11 = vld [vmem:[#allocation5 + $0x310] sm:$0xff]  }
  0x90   :  { %1715 = vmatmul.mubr.bf16.gmra.mxu1 %v312_v19  ;;  %1634 = vmatprep.mubr.bf16.mxu0 %v327_v20  ;;  %v3121_v19 = vld [vmem:[#allocation5 + $0x338] sm:$0xff]   ;;  %v285_v20 = vpack.c.bf16 %v109_v13, %v93_v12  ;;  %v3142_v13 = vld [vmem:[#allocation5 + $0x390] sm:$0xff]  }
  0x91   :  { %1722 = vmatprep.mubr.bf16.mxu1 %v329_v21  ;;  %2723 = vmatpush3.bf16.msra.mxu0 %v3113_v50  ;;  %v3122_v21 = vld [vmem:[#allocation5 + $0x3b8] sm:$0xff]  }
  0x92   :  { %2781 = vmatpush3.bf16.msra.mxu1 %v3114_v51  ;;  %2724 = vmatprep.subr.bf16.mxu0 %v3115_v52  ;;  %v173_v50 = vld [vmem:[#allocation2 + $0x3d8] sm:$0xff]  ;;  %v3132_v51 = vld [vmem:[#allocation5 + $0x3e0] sm:$0xff]  }
  0x93   :  { %2782 = vmatprep.subr.bf16.mxu1 %v3116_v54  ;;  %v3133_v52 = vld [vmem:[#allocation5 + $0x320] sm:$0xff]  }
  0x95   :  { %2725 = vmatpush3.bf16.msra.mxu0 %v3117_v57  ;;  %v317_v57 = vpack.c.bf16 %v173_v50, %v157_v49  ;;  %v81_v49 = vld [vmem:[#allocation2 + $0xf8] sm:$0xff] }
  0x96   :  { %2783 = vmatpush3.bf16.msra.mxu1 %v3118_v59  ;;  %2826 = vmatprep.subr.bf16.mxu0 %v3119_v14  ;;  %v170_v59 = vld [vmem:[#allocation2 + $0x3c0] sm:$0xff] }
  0x97   :  { %1635 = vmatmul.mubr.bf16.gmra.mxu0 %v326_v36  ;;  %2884 = vmatprep.subr.bf16.mxu1 %v3120_v15  ;;  %v284_v36 = vpack.c.bf16 %v108_v27, %v92_v26  ;;  %v186_v14 = vld [vmem:[#allocation2 + $0x440] sm:$0xff] }
  0x98   :  { %1723 = vmatmul.mubr.bf16.gmra.mxu1 %v328_v38  ;;  %1642 = vmatprep.mubr.bf16.mxu0 %v343_v39  ;;  %v3128_v38 = vld [vmem:[#allocation5 + $0x3e8] sm:$0xff]   ;;  %v301_v39 = vpack.c.bf16 %v141_v32, %v125_v31  ;;  %v202_v15 = vld [vmem:[#allocation2 + $0x4c0] sm:$0xff] }
  0x99   :  { %1730 = vmatprep.mubr.bf16.mxu1 %v345_v41  ;;  %v122_v41 = vld [vmem:[#allocation2 + $0x240] sm:$0xff]  ;;  %v330_v26 = vpack.c.bf16 %v202_v15, %v186_v14 }
  0x9a   :  { %v298_v54 = vpack.c.bf16 %v138_v42, %v122_v41  ;;  %v3147_v27 = vld [vmem:[#allocation5 + $0x340] sm:$0xff]  }
  0x9b   :  { %v3149_v32 = vld [vmem:[#allocation5 + $0x300] sm:$0xff]  }
  0x9c   :  { %v126_v14 = vld [vmem:[#allocation2 + $0x260] sm:$0xff] }
  0x9d   :  { %v142_v15 = vld [vmem:[#allocation2 + $0x2e0] sm:$0xff] }
  0x9f   :  { %1643 = vmatmul.mubr.bf16.gmra.mxu0 %v342_v53  ;;  %v3134_v53 = vld [vmem:[#allocation5 + $0x3a0] sm:$0xff]  }
  0xa0   :  { %1731 = vmatmul.mubr.bf16.gmra.mxu1 %v344_v55  ;;  %1650 = vmatprep.mubr.bf16.mxu0 %v359_v56  ;;  %v300_v55 = vpack.c.bf16 %v140_v45, %v124_v44  ;;  %v315_v56 = vpack.c.bf16 %v171_v47, %v155_v46  ;;  %v250_v44 = vld [vmem:[#allocation2 + $0x640] sm:$0x3]  ;;  %v252_v45 = vld [vmem:[#allocation2 + $0x650] sm:$0x3]  ;;  %v63_v46 = vld [vmem:[#allocation2 + $0x68] sm:$0xff] }
  0xa1   :  { %1738 = vmatprep.mubr.bf16.mxu1 %v361_v58  ;;  %v154_v58 = vld [vmem:[#allocation2 + $0x340] sm:$0xff]  ;;  %v79_v47 = vld [vmem:[#allocation2 + $0xe8] sm:$0xff]  ;;  %v362_v50 = vpack.c.bf16 %v250_v44, %v250_v44  ;;  %v208_v44 = vld [vmem:[#allocation2 + $0x4f0] sm:$0xff] }
  0xa2   :  { %v314_v7 = vpack.c.bf16 %v170_v59, %v154_v58  ;;  %v95_v58 = vld [vmem:[#allocation2 + $0x168] sm:$0xff] }
  0xa3   :  { %v111_v59 = vld [vmem:[#allocation2 + $0x1e8] sm:$0xff] }
  0xa4   :  { %v287_v0 = vpack.c.bf16 %v111_v59, %v95_v58 }
  0xa7   :  { %1651 = vmatmul.mubr.bf16.gmra.mxu0 %v358_v2  ;;  %v189_v2 = vld [vmem:[#allocation2 + $0x458] sm:$0xff] }
  0xa8   :  { %1739 = vmatmul.mubr.bf16.gmra.mxu1 %v360_v3  ;;  %1778 = vmatprep.mubr.bf16.mxu0 %v267_v4  ;;  %v205_v3 = vld [vmem:[#allocation2 + $0x4d8] sm:$0xff] }
  0xa9   :  { %1866 = vmatprep.mubr.bf16.mxu1 %v269_v5  ;;  %v3137_v4 = vld [vmem:[#allocation5 + $0x318] sm:$0xff]   ;;  %v333_v12 = vpack.c.bf16 %v205_v3, %v189_v2  ;;  %v94_v2 = vld [vmem:[#allocation2 + $0x160] sm:$0xff] }
  0xaa   :  { %v3138_v5 = vld [vmem:[#allocation5 + $0x398] sm:$0xff]   ;;  %v110_v3 = vld [vmem:[#allocation2 + $0x1e0] sm:$0xff] }
  0xaf   :  { %1779 = vmatmul.mubr.bf16.vlgmr.msra.gmra.mxu0 %v266_v16  ;;  %v188_v16 = vld [vmem:[#allocation2 + $0x450] sm:$0xff] }
  0xb0   :  { %1867 = vmatmul.mubr.bf16.vlgmr.msra.gmra.mxu1 %v268_v17  ;;  %1786 = vmatprep.mubr.bf16.mxu0 %v283_v18  ;;  %v204_v17 = vld [vmem:[#allocation2 + $0x4d0] sm:$0xff]  ;;  %v219_v18 = vld [vmem:[#allocation2 + $0x548] sm:$0xff] }
  0xb1   :  { %1874 = vmatprep.mubr.bf16.mxu1 %v285_v20  ;;  %2827 = vmatpush3.bf16.msra.mxu0 %v3121_v19  ;;  %v235_v19 = vld [vmem:[#allocation2 + $0x5c8] sm:$0xff]  ;;  %v332_v28 = vpack.c.bf16 %v204_v17, %v188_v16  ;;  %v128_v16 = vld [vmem:[#allocation2 + $0x270] sm:$0xff] }
  0xb2   :  { %2885 = vmatpush3.bf16.msra.mxu1 %v3122_v21  ;;  %2828 = vmatprep.subr.bf16.mxu0 %v3123_v23  ;;  %v3143_v20 = vld [vmem:[#allocation5 + $0x348] sm:$0xff]   ;;  %v221_v21 = vld [vmem:[#allocation2 + $0x558] sm:$0xff]  ;;  %v347_v29 = vpack.c.bf16 %v235_v19, %v219_v18  ;;  %v144_v17 = vld [vmem:[#allocation2 + $0x2f0] sm:$0xff] }
  0xb3   :  { %2886 = vmatprep.subr.bf16.mxu1 %v3124_v24  ;;  %v3144_v23 = vld [vmem:[#allocation5 + $0x3c8] sm:$0xff]   ;;  %v349_v31 = vpack.c.bf16 %v237_v22, %v221_v21  ;;  %v177_v21 = vld [vmem:[#allocation2 + $0x3f8] sm:$0xff]  ;;  %v302_v22 = vpack.c.bf16 %v142_v15, %v126_v14 }
  0xb4   :  { %v3145_v24 = vld [vmem:[#allocation5 + $0x308] sm:$0xff]  }
  0xb5   :  { %2829 = vmatpush3.bf16.msra.mxu0 %v3125_v30  ;;  %v3148_v30 = vld [vmem:[#allocation5 + $0x3c0] sm:$0xff]   ;;  %v159_v18 = vld [vmem:[#allocation2 + $0x368] sm:$0xff] }
  0xb6   :  { %2887 = vmatpush3.bf16.msra.mxu1 %v3126_v33  ;;  %2830 = vmatprep.subr.bf16.mxu0 %v3127_v35  ;;  %v3150_v33 = vld [vmem:[#allocation5 + $0x380] sm:$0xff]   ;;  %v175_v19 = vld [vmem:[#allocation2 + $0x3e8] sm:$0xff] }
  0xb7   :  { %1787 = vmatmul.mubr.bf16.gmra.mxu0 %v282_v34  ;;  %2888 = vmatprep.subr.bf16.mxu1 %v3128_v38  ;;  %v218_v34 = vld [vmem:[#allocation2 + $0x540] sm:$0xff]  ;;  %v251_v38 = vld [vmem:[#allocation2 + $0x648] sm:$0x3] }
  0xb8   :  { %1875 = vmatmul.mubr.bf16.gmra.mxu1 %v284_v36  ;;  %1794 = vmatprep.mubr.bf16.mxu0 %v299_v37  ;;  %v234_v35 = vld [vmem:[#allocation2 + $0x5c0] sm:$0xff]  ;;  %v220_v36 = vld [vmem:[#allocation2 + $0x550] sm:$0xff]  ;;  %v363_v42 = vpack.c.bf16 %v251_v38, %v251_v38 }
  0xb9   :  { %1882 = vmatprep.mubr.bf16.mxu1 %v301_v39  ;;  %2831 = vmatpush3.bf16.msra.mxu0 %v3129_v40  ;;  %v236_v37 = vld [vmem:[#allocation2 + $0x5d0] sm:$0xff]  ;;  %v253_v39 = vld [vmem:[#allocation2 + $0x658] sm:$0x3]  ;;  %v346_v40 = vpack.c.bf16 %v234_v35, %v218_v34 }
  0xba   :  { %2889 = vmatpush3.bf16.msra.mxu1 %v3130_v43  ;;  %2832 = vmatprep.subr.bf16.mxu0 %v3131_v48  ;;  %v348_v41 = vpack.c.bf16 %v236_v37, %v220_v36  ;;  %v365_v43 = vpack.c.bf16 %v253_v39, %v253_v39  ;;  %v65_v48 = vld [vmem:[#allocation2 + $0x78] sm:$0xff] }
  0xbb   :  { %2890 = vmatprep.subr.bf16.mxu1 %v3132_v51  ;;  %v364_v51 = vpack.c.bf16 %v252_v45, %v252_v45  ;;  %v223_v45 = vld [vmem:[#allocation2 + $0x568] sm:$0xff] }
  0xbd   :  { %2833 = vmatpush3.bf16.msra.mxu0 %v3133_v52  ;;  %v271_v52 = vpack.c.bf16 %v79_v47, %v63_v46  ;;  %v239_v46 = vld [vmem:[#allocation2 + $0x5e8] sm:$0xff] }
  0xbe   :  { %2891 = vmatpush3.bf16.msra.mxu1 %v3134_v53  ;;  %2834 = vmatprep.subr.bf16.mxu0 %v3135_v60  ;;  %v273_v53 = vpack.c.bf16 %v81_v49, %v65_v48  ;;  %v97_v60 = vld [vmem:[#allocation2 + $0x178] sm:$0xff] }
  0xbf   :  { %1795 = vmatmul.mubr.bf16.gmra.mxu0 %v298_v54  ;;  %2892 = vmatprep.subr.bf16.mxu1 %v3136_v1  ;;  %v62_v54 = vld [vmem:[#allocation2 + $0x60] sm:$0xff]  ;;  %v289_v1 = vpack.c.bf16 %v113_v61, %v97_v60  ;;  %v225_v49 = vld [vmem:[#allocation2 + $0x578] sm:$0xff] }
  0xc0   :  { %1883 = vmatmul.mubr.bf16.gmra.mxu1 %v300_v55  ;;  %1802 = vmatprep.mubr.bf16.mxu0 %v315_v56  ;;  %v78_v55 = vld [vmem:[#allocation2 + $0xe0] sm:$0xff]  ;;  %v64_v56 = vld [vmem:[#allocation2 + $0x70] sm:$0xff] }
  0xc1   :  { %1890 = vmatprep.mubr.bf16.mxu1 %v317_v57  ;;  %2835 = vmatpush3.bf16.msra.mxu0 %v3137_v4  ;;  %v80_v57 = vld [vmem:[#allocation2 + $0xf0] sm:$0xff]  ;;  %v270_v62 = vpack.c.bf16 %v78_v55, %v62_v54 }
  0xc2   :  { %2893 = vmatpush3.bf16.msra.mxu1 %v3138_v5  ;;  %2836 = vmatprep.subr.bf16.mxu0 %v3139_v6  ;;  %v272_v63 = vpack.c.bf16 %v80_v57, %v64_v56  ;;  %v96_v4 = vld [vmem:[#allocation2 + $0x170] sm:$0xff]  ;;  %v127_v6 = vld [vmem:[#allocation2 + $0x268] sm:$0xff]  ;;  %v351_v56 = vpack.c.bf16 %v239_v46, %v223_v45 }
  0xc3   :  { %2894 = vmatprep.subr.bf16.mxu1 %v3140_v8  ;;  %v112_v5 = vld [vmem:[#allocation2 + $0x1f0] sm:$0xff]  ;;  %v129_v8 = vld [vmem:[#allocation2 + $0x278] sm:$0xff] }
  0xc5   :  { %2837 = vmatpush3.bf16.msra.mxu0 %v3141_v11  ;;  %v288_v11 = vpack.c.bf16 %v112_v5, %v96_v4  ;;  %v224_v5 = vld [vmem:[#allocation2 + $0x570] sm:$0xff] }
  0xc6   :  { %2895 = vmatpush3.bf16.msra.mxu1 %v3142_v13  ;;  %2838 = vmatprep.subr.bf16.mxu0 %v3143_v20  ;;  %v161_v20 = vld [vmem:[#allocation2 + $0x378] sm:$0xff] }
  0xc7   :  { %1803 = vmatmul.mubr.bf16.gmra.mxu0 %v314_v7  ;;  %2896 = vmatprep.subr.bf16.mxu1 %v3144_v23  ;;  %v143_v7 = vld [vmem:[#allocation2 + $0x2e8] sm:$0xff]  ;;  %v304_v23 = vpack.c.bf16 %v144_v17, %v128_v16 }
  0xc8   :  { %1891 = vmatmul.mubr.bf16.gmra.mxu1 %v316_v9  ;;  %1810 = vmatprep.mubr.bf16.mxu0 %v331_v10  ;;  %v145_v9 = vld [vmem:[#allocation2 + $0x2f8] sm:$0xff]  ;;  %v286_v10 = vpack.c.bf16 %v110_v3, %v94_v2  ;;  %v238_v2 = vld [vmem:[#allocation2 + $0x5e0] sm:$0xff] }
  0xc9   :  { %1898 = vmatprep.mubr.bf16.mxu1 %v333_v12  ;;  %2839 = vmatpush3.bf16.msra.mxu0 %v3145_v24  ;;  %v303_v12 = vpack.c.bf16 %v143_v7, %v127_v6  ;;  %v305_v13 = vpack.c.bf16 %v145_v9, %v129_v8  ;;  %v319_v24 = vpack.c.bf16 %v175_v19, %v159_v18  ;;  %v240_v6 = vld [vmem:[#allocation2 + $0x5f0] sm:$0xff]  ;;  %v255_v7 = vld [vmem:[#allocation2 + $0x668] sm:$0x3] }
  0xca   :  { %2897 = vmatpush3.bf16.msra.mxu1 %v3146_v25  ;;  %2840 = vmatprep.subr.bf16.mxu0 %v3147_v27  ;;  %v321_v25 = vpack.c.bf16 %v177_v21, %v161_v20  ;;  %v174_v27 = vld [vmem:[#allocation2 + $0x3e0] sm:$0xff]  ;;  %v352_v15 = vpack.c.bf16 %v240_v6, %v224_v5  ;;  %v367_v16 = vpack.c.bf16 %v255_v7, %v255_v7 }
  0xcb   :  { %2898 = vmatprep.subr.bf16.mxu1 %v3148_v30  ;;  %v191_v30 = vld [vmem:[#allocation2 + $0x468] sm:$0xff] }
  0xcd   :  { %2841 = vmatpush3.bf16.msra.mxu0 %v3149_v32  ;;  %v193_v32 = vld [vmem:[#allocation2 + $0x478] sm:$0xff] }
  0xce   :  { %2899 = vmatpush3.bf16.msra.mxu1 %v3150_v33  ;;  %v209_v33 = vld [vmem:[#allocation2 + $0x4f8] sm:$0xff] }
  0xcf   :  { %1811 = vmatmul.mubr.bf16.gmra.mxu0 %v330_v26  ;;  %v158_v26 = vld [vmem:[#allocation2 + $0x360] sm:$0xff]  ;;  %v337_v37 = vpack.c.bf16 %v209_v33, %v193_v32 }
  0xd0   :  { %1899 = vmatmul.mubr.bf16.gmra.mxu1 %v332_v28  ;;  %1818 = vmatprep.mubr.bf16.mxu0 %v347_v29  ;;  %v160_v28 = vld [vmem:[#allocation2 + $0x370] sm:$0xff]  ;;  %v318_v34 = vpack.c.bf16 %v174_v27, %v158_v26 }
  0xd1   :  { %1906 = vmatprep.mubr.bf16.mxu1 %v349_v31  ;;  %v176_v29 = vld [vmem:[#allocation2 + $0x3f0] sm:$0xff]  ;;  %v207_v31 = vld [vmem:[#allocation2 + $0x4e8] sm:$0xff] }
  0xd2   :  { %v320_v35 = vpack.c.bf16 %v176_v29, %v160_v28  ;;  %v335_v36 = vpack.c.bf16 %v207_v31, %v191_v30  ;;  %v256_v28 = vld [vmem:[#allocation2 + $0x670] sm:$0x3] }
  0xd7   :  { %1819 = vmatmul.mubr.bf16.gmra.mxu0 %v346_v40  ;;  %v190_v40 = vld [vmem:[#allocation2 + $0x460] sm:$0xff] }
  0xd8   :  { %1907 = vmatmul.mubr.bf16.gmra.mxu1 %v348_v41  ;;  %1826 = vmatprep.mubr.bf16.mxu0 %v363_v42  ;;  %v206_v41 = vld [vmem:[#allocation2 + $0x4e0] sm:$0xff]  ;;  %v192_v42 = vld [vmem:[#allocation2 + $0x470] sm:$0xff] }
  0xd9   :  { %1914 = vmatprep.mubr.bf16.mxu1 %v365_v43  ;;  %v336_v55 = vpack.c.bf16 %v208_v44, %v192_v42 }
  0xdf   :  { %1827 = vmatmul.mubr.bf16.gmra.mxu0 %v362_v50  ;;  %v241_v50 = vld [vmem:[#allocation2 + $0x5f8] sm:$0xff] }
  0xe0   :  { %1915 = vmatmul.mubr.bf16.gmra.mxu1 %v364_v51  ;;  %1954 = vmatprep.mubr.bf16.mxu0 %v271_v52  ;;  %v353_v59 = vpack.c.bf16 %v241_v50, %v225_v49 }
  0xe1   :  { %2042 = vmatprep.mubr.bf16.mxu1 %v273_v53  ;;  %v334_v53 = vpack.c.bf16 %v206_v41, %v190_v40 }
  0xe7   :  { %1955 = vmatmul.mubr.bf16.vlgmr.msra.gmra.mxu0 %v270_v62 }
  0xe8   :  { %2043 = vmatmul.mubr.bf16.vlgmr.msra.gmra.mxu1 %v272_v63  ;;  %1962 = vmatprep.mubr.bf16.mxu0 %v287_v0 }
  0xe9   :  { %2050 = vmatprep.mubr.bf16.mxu1 %v289_v1  ;;  %v222_v1 = vld [vmem:[#allocation2 + $0x560] sm:$0xff] }
  0xef   :  { %1963 = vmatmul.mubr.bf16.gmra.mxu0 %v286_v10  ;;  %v257_v10 = vld [vmem:[#allocation2 + $0x678] sm:$0x3] }
  0xf0   :  { %2051 = vmatmul.mubr.bf16.gmra.mxu1 %v288_v11  ;;  %1970 = vmatprep.mubr.bf16.mxu0 %v303_v12  ;;  %v369_v19 = vpack.c.bf16 %v257_v10, %v257_v10 }
  0xf1   :  { %2058 = vmatprep.mubr.bf16.mxu1 %v305_v13  ;;  %v350_v13 = vpack.c.bf16 %v238_v2, %v222_v1 }
  0xf7   :  { %1971 = vmatmul.mubr.bf16.gmra.mxu0 %v302_v22 }
  0xf8   :  { %2059 = vmatmul.mubr.bf16.gmra.mxu1 %v304_v23  ;;  %1978 = vmatprep.mubr.bf16.mxu0 %v319_v24 }
  0xf9   :  { %2066 = vmatprep.mubr.bf16.mxu1 %v321_v25  ;;  %v254_v25 = vld [vmem:[#allocation2 + $0x660] sm:$0x3] }
  0xfa   :  { %v366_v33 = vpack.c.bf16 %v254_v25, %v254_v25 }
  0xff   :  { %v2494_v38 = vpop.f32.mrf.mxu0  ;;  %1979 = vmatmul.mubr.bf16.gmra.mxu0 %v318_v34 }
 0x100   :  { %v2552_v39 = vpop.f32.mrf.mxu1  ;;  %2067 = vmatmul.mubr.bf16.gmra.mxu1 %v320_v35  ;;  %1986 = vmatprep.mubr.bf16.mxu0 %v335_v36  ;;  %v368_v35 = vpack.c.bf16 %v256_v28, %v256_v28 }
 0x101   :  { %v2495_v43 = vpop.f32.mrf.mxu0  ;;  %2074 = vmatprep.mubr.bf16.mxu1 %v337_v37 }
 0x102   :  { %v2496_v47 = vadd.f32 %v2495_v43, %v2494_v38  ;;  %v2553_v48 = vpop.f32.mrf.mxu1 }
 0x103   :  { %v2554_v51 = vadd.f32 %v2553_v48, %v2552_v39  ;;  %v2497_v52 = vpop.f32.mrf.mxu0 }
 0x104   :  { %v2555_v54 = vpop.f32.mrf.mxu1 }
 0x105   :  { %v3274_v57 = vadd.f32 %v2554_v51, %v2496_v47  ;;  %v2498_v58 = vpop.f32.mrf.mxu0 }
 0x106   :  { %v2499_v60 = vadd.f32 %v2498_v58, %v2497_v52  ;;  %v2556_v61 = vpop.f32.mrf.mxu1 }
 0x107   :  { %v2557_v62 = vadd.f32 %v2556_v61, %v2555_v54  ;;  %v2500_v63 = vpop.f32.mrf.mxu0  ;;  %1987 = vmatmul.mubr.bf16.gmra.mxu0 %v334_v53 }
 0x108   :  { %v2558_v0 = vpop.f32.mrf.mxu1  ;;  %2075 = vmatmul.mubr.bf16.gmra.mxu1 %v336_v55  ;;  %1994 = vmatprep.mubr.bf16.mxu0 %v351_v56 }
 0x109   :  { %v3276_v3 = vadd.f32 %v2557_v62, %v2499_v60  ;;  %v2501_v4 = vpop.f32.mrf.mxu0  ;;  %2082 = vmatprep.mubr.bf16.mxu1 %v353_v59 }
 0x10a   :  { %v2502_v8 = vadd.f32 %v2501_v4, %v2500_v63  ;;  %v2559_v9 = vpop.f32.mrf.mxu1 }
 0x10b   :  { %v2560_v11 = vadd.f32 %v2559_v9, %v2558_v0  ;;  %v2503_v12 = vpop.f32.mrf.mxu0 }
 0x10c   :  { %v2561_v14 = vpop.f32.mrf.mxu1 }
 0x10d   :  { %v3278_v17 = vadd.f32 %v2560_v11, %v2502_v8  ;;  %v2504_v18 = vpop.f32.mrf.mxu0 }
 0x10e   :  { %v2505_v20 = vadd.f32 %v2504_v18, %v2503_v12  ;;  %v2562_v21 = vpop.f32.mrf.mxu1 }
 0x10f   :  { %v2563_v22 = vadd.f32 %v2562_v21, %v2561_v14  ;;  %v2506_v23 = vpop.f32.mrf.mxu0  ;;  %1995 = vmatmul.mubr.bf16.gmra.mxu0 %v350_v13 }
 0x110   :  { %v2564_v24 = vpop.f32.mrf.mxu1  ;;  %2083 = vmatmul.mubr.bf16.gmra.mxu1 %v352_v15  ;;  %2002 = vmatprep.mubr.bf16.mxu0 %v367_v16 }
 0x111   :  { %v3280_v26 = vadd.f32 %v2563_v22, %v2505_v20  ;;  %v2507_v27 = vpop.f32.mrf.mxu0  ;;  %2090 = vmatprep.mubr.bf16.mxu1 %v369_v19 }
 0x112   :  { %v2508_v29 = vadd.f32 %v2507_v27, %v2506_v23  ;;  %v2565_v30 = vpop.f32.mrf.mxu1 }
 0x113   :  { %v2566_v31 = vadd.f32 %v2565_v30, %v2564_v24  ;;  %v2509_v32 = vpop.f32.mrf.mxu0 }
 0x114   :  { %v2567_v34 = vpop.f32.mrf.mxu1 }
 0x115   :  { %v3282_v36 = vadd.f32 %v2566_v31, %v2508_v29  ;;  %v2510_v37 = vpop.f32.mrf.mxu0 }
 0x116   :  { %v2511_v38 = vadd.f32 %v2510_v37, %v2509_v32  ;;  %v2568_v39 = vpop.f32.mrf.mxu1 }
 0x117   :  { %v2569_v40 = vadd.f32 %v2568_v39, %v2567_v34  ;;  %v2512_v41 = vpop.f32.mrf.mxu0  ;;  %2003 = vmatmul.mubr.bf16.gmra.mxu0 %v366_v33 }
 0x118   :  { %v2570_v42 = vpop.f32.mrf.mxu1  ;;  %2091 = vmatmul.mubr.bf16.gmra.mxu1 %v368_v35 }
 0x119   :  { %v3284_v43 = vadd.f32 %v2569_v40, %v2511_v38  ;;  %v2513_v44 = vpop.f32.mrf.mxu0 }
 0x11a   :  { %v2514_v45 = vadd.f32 %v2513_v44, %v2512_v41  ;;  %v2571_v46 = vpop.f32.mrf.mxu1 }
 0x11b   :  { %v2572_v47 = vadd.f32 %v2571_v46, %v2570_v42  ;;  %v2515_v48 = vpop.f32.mrf.mxu0 }
 0x11c   :  { %v2573_v49 = vpop.f32.mrf.mxu1 }
 0x11d   :  { %v3286_v50 = vadd.f32 %v2572_v47, %v2514_v45  ;;  %v2516_v51 = vpop.f32.mrf.mxu0 }
 0x11e   :  { %v2517_v52 = vadd.f32 %v2516_v51, %v2515_v48  ;;  %v2574_v53 = vpop.f32.mrf.mxu1 }
 0x11f   :  { %v2575_v54 = vadd.f32 %v2574_v53, %v2573_v49  ;;  %v2518_v55 = vpop.f32.mrf.mxu0 }
 0x120   :  { %v2576_v56 = vpop.f32.mrf.mxu1 }
 0x121   :  { %v3288_v58 = vadd.f32 %v2575_v54, %v2517_v52  ;;  %v2519_v59 = vpop.f32.mrf.mxu0 }
 0x122   :  { %v2520_v60 = vadd.f32 %v2519_v59, %v2518_v55  ;;  %v2577_v61 = vpop.f32.mrf.mxu1 }
 0x123   :  { %v2578_v62 = vadd.f32 %v2577_v61, %v2576_v56  ;;  %v2521_v63 = vpop.f32.mrf.mxu0 }
 0x124   :  { %v2579_v0 = vpop.f32.mrf.mxu1 }
 0x125   :  { %v3290_v1 = vadd.f32 %v2578_v62, %v2520_v60  ;;  %v2522_v2 = vpop.f32.mrf.mxu0 }
 0x126   :  { %v2523_v4 = vadd.f32 %v2522_v2, %v2521_v63  ;;  %v2580_v5 = vpop.f32.mrf.mxu1 }
 0x127   :  { %v2581_v6 = vadd.f32 %v2580_v5, %v2579_v0  ;;  %v2524_v7 = vpop.f32.mrf.mxu0 }
 0x128   :  { %v2582_v8 = vpop.f32.mrf.mxu1 }
 0x129   :  { %v3292_v9 = vadd.f32 %v2581_v6, %v2523_v4  ;;  %v2525_v10 = vpop.f32.mrf.mxu0 }
 0x12a   :  { %v2526_v11 = vadd.f32 %v2525_v10, %v2524_v7  ;;  %v2583_v12 = vpop.f32.mrf.mxu1 }
 0x12b   :  { %v2584_v13 = vadd.f32 %v2583_v12, %v2582_v8  ;;  %v2527_v14 = vpop.f32.mrf.mxu0 }
 0x12c   :  { %v2585_v15 = vpop.f32.mrf.mxu1 }
 0x12d   :  { %v3294_v16 = vadd.f32 %v2584_v13, %v2526_v11  ;;  %v2528_v18 = vpop.f32.mrf.mxu0 }
 0x12e   :  { %v2529_v19 = vadd.f32 %v2528_v18, %v2527_v14  ;;  %v2586_v20 = vpop.f32.mrf.mxu1 }
 0x12f   :  { %v2587_v21 = vadd.f32 %v2586_v20, %v2585_v15  ;;  %v2530_v22 = vpop.f32.mrf.mxu0 }
 0x130   :  { %v2588_v23 = vpop.f32.mrf.mxu1 }
 0x131   :  { %v3296_v24 = vadd.f32 %v2587_v21, %v2529_v19  ;;  %v2531_v25 = vpop.f32.mrf.mxu0 }
 0x132   :  { %v2532_v27 = vadd.f32 %v2531_v25, %v2530_v22  ;;  %v2589_v28 = vpop.f32.mrf.mxu1 }
 0x133   :  { %v2590_v29 = vadd.f32 %v2589_v28, %v2588_v23  ;;  %v2533_v30 = vpop.f32.mrf.mxu0 }
 0x134   :  { %v2591_v31 = vpop.f32.mrf.mxu1 }
 0x135   :  { %v3298_v32 = vadd.f32 %v2590_v29, %v2532_v27  ;;  %v2534_v33 = vpop.f32.mrf.mxu0 }
 0x136   :  { %v2592_v34 = vpop.f32.mrf.mxu1 }
 0x137   :  { %v2610_v35 = vpop.f32.mrf.mxu0 }
 0x138   :  { %v2668_v37 = vpop.f32.mrf.mxu1 }
 0x139   :  { %v2611_v38 = vpop.f32.mrf.mxu0 }
 0x13a   :  { %v2612_v39 = vadd.f32 %v2611_v38, %v2610_v35  ;;  %v2669_v40 = vpop.f32.mrf.mxu1 }
 0x13b   :  { %v2670_v41 = vadd.f32 %v2669_v40, %v2668_v37  ;;  %v2613_v42 = vpop.f32.mrf.mxu0 }
 0x13c   :  { %v1605_v44 = vadd.f32 %v2612_v39, %v3274_v57  ;;  %v2671_v45 = vpop.f32.mrf.mxu1 }
 0x13d   :  { %v2614_v46 = vpop.f32.mrf.mxu0 }
 0x13e   :  { %v3301_v47 = vadd.f32 %v2670_v41, %v1605_v44  ;;  %v2615_v48 = vadd.f32 %v2614_v46, %v2613_v42  ;;  %v2672_v49 = vpop.f32.mrf.mxu1 }
 0x13f   :  { %v2673_v51 = vadd.f32 %v2672_v49, %v2671_v45  ;;  %v2616_v52 = vpop.f32.mrf.mxu0 }
 0x140   :  { %v1608_v53 = vadd.f32 %v2615_v48, %v3276_v3  ;;  %v2674_v54 = vpop.f32.mrf.mxu1 }
 0x141   :  { %v2617_v55 = vpop.f32.mrf.mxu0 }
 0x142   :  { %v3304_v56 = vadd.f32 %v2673_v51, %v1608_v53  ;;  %v2618_v59 = vadd.f32 %v2617_v55, %v2616_v52  ;;  %v2675_v60 = vpop.f32.mrf.mxu1 }
 0x143   :  { %v2676_v61 = vadd.f32 %v2675_v60, %v2674_v54  ;;  %v2619_v62 = vpop.f32.mrf.mxu0 }
 0x144   :  { %v1613_v57 = vadd.f32 %v2618_v59, %v3278_v17  ;;  %v2677_v63 = vpop.f32.mrf.mxu1 }
 0x145   :  { %v2620_v0 = vpop.f32.mrf.mxu0 }
 0x146   :  { %v3307_v2 = vadd.f32 %v2676_v61, %v1613_v57  ;;  %v2621_v4 = vadd.f32 %v2620_v0, %v2619_v62  ;;  %v2678_v5 = vpop.f32.mrf.mxu1  ;;  %v3532_v57 = vmov 0.0  }
 0x147   :  { %v2679_v6 = vadd.f32 %v2678_v5, %v2677_v63  ;;  %v2622_v7 = vpop.f32.mrf.mxu0  ;;  %2965 = vmatprep.subr.mxu0 %v3532_v57  ;;  %2994 = vmatprep.subr.bf16.mxu1 %v3532_v57 }
 0x148   :  { %v1616_v3 = vadd.f32 %v2621_v4, %v3280_v26  ;;  %v2680_v8 = vpop.f32.mrf.mxu1  ;;  %2991 = vmatprep.mubr.msk.f32.mxu0 %vm3236_vm0, %v3532_v57  ;;  %3010 = vmatprep.mubr.msk.bf16.mxu1 %vm3236_vm0, %v3532_v57 }
 0x149   :  { %v2623_v10 = vpop.f32.mrf.mxu0 }
 0x14a   :  { %v3310_v11 = vadd.f32 %v2679_v6, %v1616_v3  ;;  %v2624_v12 = vadd.f32 %v2623_v10, %v2622_v7  ;;  %v2681_v13 = vpop.f32.mrf.mxu1 }
 0x14b   :  { %v2682_v14 = vadd.f32 %v2681_v13, %v2680_v8  ;;  %v2625_v15 = vpop.f32.mrf.mxu0 }
 0x14c   :  { %v1621_v17 = vadd.f32 %v2624_v12, %v3282_v36  ;;  %v2683_v18 = vpop.f32.mrf.mxu1 }
 0x14d   :  { %v2626_v19 = vpop.f32.mrf.mxu0 }
 0x14e   :  { %v3313_v20 = vadd.f32 %v2682_v14, %v1621_v17  ;;  %v2627_v21 = vadd.f32 %v2626_v19, %v2625_v15  ;;  %v2684_v22 = vpop.f32.mrf.mxu1 }
 0x14f   :  { %v2685_v23 = vadd.f32 %v2684_v22, %v2683_v18  ;;  %v2628_v25 = vpop.f32.mrf.mxu0 }
 0x150   :  { %v1624_v26 = vadd.f32 %v2627_v21, %v3284_v43  ;;  %v2686_v27 = vpop.f32.mrf.mxu1 }
 0x151   :  { %v2629_v28 = vpop.f32.mrf.mxu0 }
 0x152   :  { %v3316_v29 = vadd.f32 %v2685_v23, %v1624_v26  ;;  %v2630_v30 = vadd.f32 %v2629_v28, %v2628_v25  ;;  %v2687_v31 = vpop.f32.mrf.mxu1 }
 0x153   :  { %v2688_v33 = vadd.f32 %v2687_v31, %v2686_v27  ;;  %v2631_v34 = vpop.f32.mrf.mxu0 }
 0x154   :  { %v1629_v36 = vadd.f32 %v2630_v30, %v3286_v50  ;;  %v2689_v35 = vpop.f32.mrf.mxu1 }
 0x155   :  { %v2632_v37 = vpop.f32.mrf.mxu0 }
 0x156   :  { %v3319_v38 = vadd.f32 %v2688_v33, %v1629_v36  ;;  %v2633_v39 = vadd.f32 %v2632_v37, %v2631_v34  ;;  %v2690_v40 = vpop.f32.mrf.mxu1 }
 0x157   :  { %v2691_v41 = vadd.f32 %v2690_v40, %v2689_v35  ;;  %v2634_v42 = vpop.f32.mrf.mxu0 }
 0x158   :  { %v1632_v43 = vadd.f32 %v2633_v39, %v3288_v58  ;;  %v2692_v44 = vpop.f32.mrf.mxu1 }
 0x159   :  { %v2635_v45 = vpop.f32.mrf.mxu0 }
 0x15a   :  { %v3322_v46 = vadd.f32 %v2691_v41, %v1632_v43  ;;  %v2636_v48 = vadd.f32 %v2635_v45, %v2634_v42  ;;  %v2693_v49 = vpop.f32.mrf.mxu1 }
 0x15b   :  { %v2694_v51 = vadd.f32 %v2693_v49, %v2692_v44  ;;  %v2637_v52 = vpop.f32.mrf.mxu0 }
 0x15c   :  { %v1637_v50 = vadd.f32 %v2636_v48, %v3290_v1  ;;  %v2695_v53 = vpop.f32.mrf.mxu1 }
 0x15d   :  { %v2638_v54 = vpop.f32.mrf.mxu0 }
 0x15e   :  { %v3325_v55 = vadd.f32 %v2694_v51, %v1637_v50  ;;  %v2639_v59 = vadd.f32 %v2638_v54, %v2637_v52  ;;  %v2696_v60 = vpop.f32.mrf.mxu1  ;;  %v3151_v50 = vld [vmem:[%s3529_s3 + $0x38] sm:$0xff]  }
 0x15f   :  { %v2697_v61 = vadd.f32 %v2696_v60, %v2695_v53  ;;  %v2640_v62 = vpop.f32.mrf.mxu0  ;;  %2995 = vmatpush3.bf16.msra.mxu1 %v3151_v50 }
 0x160   :  { %v1640_v58 = vadd.f32 %v2639_v59, %v3292_v9  ;;  %v2698_v63 = vpop.f32.mrf.mxu1  ;;  %2996 = vmatprep.subr.bf16.mxu1 %v3532_v57 }
 0x161   :  { %v2641_v0 = vpop.f32.mrf.mxu0 }
 0x162   :  { %v3330_v4 = vadd.f32 %v2697_v61, %v1640_v58  ;;  %v2642_v1 = vadd.f32 %v2641_v0, %v2640_v62  ;;  %v2699_v5 = vpop.f32.mrf.mxu1 }
 0x163   :  { %v2700_v6 = vadd.f32 %v2699_v5, %v2698_v63  ;;  %v2643_v7 = vpop.f32.mrf.mxu0 }
 0x164   :  { %v1645_v3 = vadd.f32 %v2642_v1, %v3294_v16  ;;  %v2701_v8 = vpop.f32.mrf.mxu1 }
 0x165   :  { %v2644_v10 = vpop.f32.mrf.mxu0 }
 0x166   :  { %v3333_v12 = vadd.f32 %v2700_v6, %v1645_v3  ;;  %v2645_v13 = vadd.f32 %v2644_v10, %v2643_v7  ;;  %v2702_v14 = vpop.f32.mrf.mxu1  ;;  %v3153_v7 = vld [vmem:[%s3529_s3 + $0x28] sm:$0xff]  }
 0x167   :  { %v2703_v15 = vadd.f32 %v2702_v14, %v2701_v8  ;;  %v2646_v17 = vpop.f32.mrf.mxu0 }
 0x168   :  { %v1648_v9 = vadd.f32 %v2645_v13, %v3296_v24  ;;  %v2704_v18 = vpop.f32.mrf.mxu1 }
 0x169   :  { %v2647_v19 = vpop.f32.mrf.mxu0 }
 0x16a   :  { %v3336_v21 = vadd.f32 %v2703_v15, %v1648_v9  ;;  %v2648_v22 = vadd.f32 %v2647_v19, %v2646_v17  ;;  %v2705_v23 = vpop.f32.mrf.mxu1  ;;  %v3154_v9 = vld [vmem:[%s3529_s3 + $0x20] sm:$0xff]  }
 0x16b   :  { %v2706_v25 = vadd.f32 %v2705_v23, %v2704_v18  ;;  %v2649_v26 = vpop.f32.mrf.mxu0 }
 0x16c   :  { %v1653_v16 = vadd.f32 %v2648_v22, %v3298_v32  ;;  %v2707_v27 = vpop.f32.mrf.mxu1 }
 0x16d   :  { %v2650_v28 = vpop.f32.mrf.mxu0  ;;  %v3155_v27 = vld [vmem:[%s3529_s3 + $0x18] sm:$0xff]  }
 0x16e   :  { %v3339_v30 = vadd.f32 %v2706_v25, %v1653_v16  ;;  %v2708_v31 = vpop.f32.mrf.mxu1 }
 0x16f   :  { %v2726_v33 = vpop.f32.mrf.mxu0 }
 0x170   :  { %v2784_v34 = vpop.f32.mrf.mxu1 }
 0x171   :  { %v2727_v36 = vpop.f32.mrf.mxu0 }
 0x172   :  { %v2728_v35 = vadd.f32 %v2727_v36, %v2726_v33  ;;  %v2785_v24 = vpop.f32.mrf.mxu1 }
 0x173   :  { %v2786_v37 = vadd.f32 %v2785_v24, %v2784_v34  ;;  %v2729_v39 = vpop.f32.mrf.mxu0 }
 0x174   :  { %v1781_v40 = vadd.f32 %v2728_v35, %v3301_v47  ;;  %v2787_v41 = vpop.f32.mrf.mxu1 }
 0x175   :  { %v2730_v42 = vpop.f32.mrf.mxu0 }
 0x176   :  { %v3342_v43 = vadd.f32 %v2786_v37, %v1781_v40  ;;  %v2731_v44 = vadd.f32 %v2730_v42, %v2729_v39  ;;  %v2788_v32 = vpop.f32.mrf.mxu1  ;;  %v3156_v37 = vld [vmem:[%s3529_s3 + $0x10] sm:$0xff]  }
 0x177   :  { %v2789_v45 = vadd.f32 %v2788_v32, %v2787_v41  ;;  %v2732_v48 = vpop.f32.mrf.mxu0 }
 0x178   :  { %v1784_v49 = vadd.f32 %v2731_v44, %v3304_v56  ;;  %v2790_v51 = vpop.f32.mrf.mxu1  ;;  %v3152_v56 = vld [vmem:[%s3529_s3 + $0x30] sm:$0xff]  }
 0x179   :  { %v2733_v52 = vpop.f32.mrf.mxu0  ;;  %2997 = vmatpush3.bf16.msra.mxu1 %v3152_v56 }
 0x17a   :  { %v3350_v47 = vadd.f32 %v2789_v45, %v1784_v49  ;;  %v2734_v53 = vadd.f32 %v2733_v52, %v2732_v48  ;;  %v2791_v54 = vpop.f32.mrf.mxu1  ;;  %2998 = vmatprep.subr.bf16.mxu1 %v3532_v57  ;;  %v3157_v48 = vld [vmem:[%s3529_s3 + $0x8] sm:$0xff]  }
 0x17b   :  { %v2792_v59 = vadd.f32 %v2791_v54, %v2790_v51  ;;  %v2735_v60 = vpop.f32.mrf.mxu0 }
 0x17c   :  { %v1789_v61 = vadd.f32 %v2734_v53, %v3307_v2  ;;  %v2793_v62 = vpop.f32.mrf.mxu1 }
 0x17d   :  { %v2736_v58 = vpop.f32.mrf.mxu0  ;;  %2999 = vmatpush3.bf16.msra.mxu1 %v3153_v7 }
 0x17e   :  { %v3357_v63 = vadd.f32 %v2792_v59, %v1789_v61  ;;  %v2737_v0 = vadd.f32 %v2736_v58, %v2735_v60  ;;  %v2794_v1 = vpop.f32.mrf.mxu1  ;;  %3000 = vmatprep.subr.bf16.mxu1 %v3532_v57 }
 0x17f   :  { %v2795_v5 = vadd.f32 %v2794_v1, %v2793_v62  ;;  %v2738_v6 = vpop.f32.mrf.mxu0 }
 0x180   :  { %3534 = vst [vmem:[#allocation11_spill] sm:$0xff] %v3357_v63  ;;  %v1792_v3 = vadd.f32 %v2737_v0, %v3310_v11  ;;  %v2796_v8 = vpop.f32.mrf.mxu1 }
 0x181   :  { %v2739_v2 = vpop.f32.mrf.mxu0  ;;  %3001 = vmatpush3.bf16.msra.mxu1 %v3154_v9 }
 0x182   :  { %v3364_v10 = vadd.f32 %v2795_v5, %v1792_v3  ;;  %v2740_v13 = vadd.f32 %v2739_v2, %v2738_v6  ;;  %v2797_v14 = vpop.f32.mrf.mxu1  ;;  %3002 = vmatprep.subr.bf16.mxu1 %v3532_v57 }
 0x183   :  { %v2798_v15 = vadd.f32 %v2797_v14, %v2796_v8  ;;  %v2741_v17 = vpop.f32.mrf.mxu0 }
 0x184   :  { %3535 = vst [vmem:[#allocation12_spill] sm:$0xff] %v3364_v10  ;;  %v1797_v18 = vadd.f32 %v2740_v13, %v3313_v20  ;;  %v2799_v19 = vpop.f32.mrf.mxu1 }
 0x185   :  { %v2742_v11 = vpop.f32.mrf.mxu0  ;;  %3003 = vmatpush3.bf16.msra.mxu1 %v3155_v27 }
 0x186   :  { %v3371_v22 = vadd.f32 %v2798_v15, %v1797_v18  ;;  %v2743_v23 = vadd.f32 %v2742_v11, %v2741_v17  ;;  %v2800_v25 = vpop.f32.mrf.mxu1  ;;  %3004 = vmatprep.subr.bf16.mxu1 %v3532_v57 }
 0x187   :  { %v2801_v26 = vadd.f32 %v2800_v25, %v2799_v19  ;;  %v2744_v16 = vpop.f32.mrf.mxu0 }
 0x188   :  { %v1800_v28 = vadd.f32 %v2743_v23, %v3316_v29  ;;  %v2802_v31 = vpop.f32.mrf.mxu1 }
 0x189   :  { %v2745_v20 = vpop.f32.mrf.mxu0  ;;  %3005 = vmatpush3.bf16.msra.mxu1 %v3156_v37 }
 0x18a   :  { %v3378_v33 = vadd.f32 %v2801_v26, %v1800_v28  ;;  %v2746_v34 = vadd.f32 %v2745_v20, %v2744_v16  ;;  %v2803_v36 = vpop.f32.mrf.mxu1  ;;  %3006 = vmatprep.subr.bf16.mxu1 %v3532_v57 }
 0x18b   :  { %v2804_v35 = vadd.f32 %v2803_v36, %v2802_v31  ;;  %v2747_v24 = vpop.f32.mrf.mxu0 }
 0x18c   :  { %v1805_v39 = vadd.f32 %v2746_v34, %v3319_v38  ;;  %v2805_v40 = vpop.f32.mrf.mxu1 }
 0x18d   :  { %v2748_v29 = vpop.f32.mrf.mxu0  ;;  %3007 = vmatpush3.bf16.msra.mxu1 %v3157_v48 }
 0x18e   :  { %v3385_v41 = vadd.f32 %v2804_v35, %v1805_v39  ;;  %v2749_v42 = vadd.f32 %v2748_v29, %v2747_v24  ;;  %v2806_v44 = vpop.f32.mrf.mxu1  ;;  %3008 = vmatprep.subr.bf16.mxu1 %v3532_v57 }
 0x18f   :  { %v2807_v32 = vadd.f32 %v2806_v44, %v2805_v40  ;;  %v2750_v45 = vpop.f32.mrf.mxu0 }
 0x190   :  { %v1808_v49 = vadd.f32 %v2749_v42, %v3322_v46  ;;  %v2808_v51 = vpop.f32.mrf.mxu1 }
 0x191   :  { %v2751_v38 = vpop.f32.mrf.mxu0 }
 0x192   :  { %v3392_v52 = vadd.f32 %v2807_v32, %v1808_v49  ;;  %v2752_v50 = vadd.f32 %v2751_v38, %v2750_v45  ;;  %v2809_v53 = vpop.f32.mrf.mxu1 }
 0x193   :  { %v2810_v54 = vadd.f32 %v2809_v53, %v2808_v51  ;;  %v2753_v59 = vpop.f32.mrf.mxu0 }
 0x194   :  { %v1813_v60 = vadd.f32 %v2752_v50, %v3325_v55  ;;  %v2811_v56 = vpop.f32.mrf.mxu1 }
 0x195   :  { %v2754_v61 = vpop.f32.mrf.mxu0 }
 0x196   :  { %v3396_v62 = vadd.f32 %v2810_v54, %v1813_v60  ;;  %v2755_v46 = vadd.f32 %v2754_v61, %v2753_v59  ;;  %v2812_v58 = vpop.f32.mrf.mxu1 }
 0x197   :  { %v2813_v0 = vadd.f32 %v2812_v58, %v2811_v56  ;;  %v2756_v1 = vpop.f32.mrf.mxu0 }
 0x198   :  { %v1816_v5 = vadd.f32 %v2755_v46, %v3330_v4  ;;  %v2814_v6 = vpop.f32.mrf.mxu1 }
 0x199   :  { %v2757_v7 = vpop.f32.mrf.mxu0 }
 0x19a   :  { %v3399_v3 = vadd.f32 %v2813_v0, %v1816_v5  ;;  %v2758_v8 = vadd.f32 %v2757_v7, %v2756_v1  ;;  %v2815_v2 = vpop.f32.mrf.mxu1 }
 0x19b   :  { %v2816_v13 = vadd.f32 %v2815_v2, %v2814_v6  ;;  %v3401_v55 = vpop.f32.mrf.mxu0 }
 0x19c   :  { %v1821_v14 = vadd.f32 %v2758_v8, %v3333_v12  ;;  %v3404_v15 = vpop.f32.mrf.mxu1 }
 0x19d   :  { %v2760_v17 = vpop.f32.mrf.mxu0 }
 0x19e   :  { %v3406_v9 = vadd.f32 %v2816_v13, %v1821_v14  ;;  %v3408_v18 = vpop.f32.mrf.mxu1 }
 0x19f   :  { %v2762_v19 = vpop.f32.mrf.mxu0 }
 0x1a0   :  { %v3410_v4 = vpop.f32.mrf.mxu1 }
 0x1a1   :  { %v2763_v11 = vpop.f32.mrf.mxu0 }
 0x1a2   :  { %v3412_v23 = vpop.f32.mrf.mxu1 }
 0x1a3   :  { %v2765_v25 = vpop.f32.mrf.mxu0 }
 0x1a4   :  { %v2823_v26 = vpop.f32.mrf.mxu1 }
 0x1a5   :  { %v2766_v16 = vpop.f32.mrf.mxu0 }
 0x1a6   :  { %v2824_v27 = vpop.f32.mrf.mxu1 }
 0x1a7   :  { %v2842_v28 = vpop.f32.mrf.mxu0 }
 0x1a8   :  { %v2900_v31 = vpop.f32.mrf.mxu1 }
 0x1a9   :  { %v2843_v12 = vpop.f32.mrf.mxu0 }
 0x1aa   :  { %v2844_v20 = vadd.f32 %v2843_v12, %v2842_v28  ;;  %v2901_v34 = vpop.f32.mrf.mxu1 }
 0x1ab   :  { %v2902_v36 = vadd.f32 %v2901_v34, %v2900_v31  ;;  %v2845_v35 = vpop.f32.mrf.mxu0 }
 0x1ac   :  { %v1957_v24 = vadd.f32 %v2844_v20, %v3342_v43  ;;  %v2903_v37 = vpop.f32.mrf.mxu1 }
 0x1ad   :  { %v2846_v39 = vpop.f32.mrf.mxu0 }
 0x1ae   :  { %v3415_v40 = vadd.f32 %v2902_v36, %v1957_v24  ;;  %v2847_v29 = vadd.f32 %v2846_v39, %v2845_v35  ;;  %v2904_v42 = vpop.f32.mrf.mxu1  ;;  %v2761_v24 = vadd.f32 %v2760_v17, %v3401_v55 }
 0x1af   :  { %v2905_v44 = vadd.f32 %v2904_v42, %v2903_v37  ;;  %v3417_v32 = vpop.f32.mrf.mxu0  ;;  %v2764_v37 = vadd.f32 %v2763_v11, %v2762_v19 }
 0x1b0   :  { %3536 = vst [vmem:[#allocation13_spill] sm:$0xff] %v3415_v40  ;;  %v1960_v45 = vadd.f32 %v2847_v29, %v3350_v47  ;;  %v3420_v48 = vpop.f32.mrf.mxu1 }
 0x1b1   :  { %3537 = vst [vmem:[#allocation14_spill] sm:$0xff] %v3420_v48  ;;  %v3422_v49 = vpop.f32.mrf.mxu0  ;;  %v1829_v57 = vadd.f32 %v2764_v37, %v3339_v30  ;;  %v2822_v48 = vadd.f32 %v3412_v23, %v3410_v4 }
 0x1b2   :  { %v3424_v51 = vadd.f32 %v2905_v44, %v1960_v45  ;;  %v3426_v38 = vpop.f32.mrf.mxu1  ;;  %v1824_v45 = vadd.f32 %v2761_v24, %v3336_v21 }
 0x1b3   :  { %3539 = vst [vmem:[#allocation16_spill] sm:$0xff] %v3426_v38  ;;  %v3428_v43 = vpop.f32.mrf.mxu0  ;;  %v2819_v38 = vadd.f32 %v3408_v18, %v3404_v15  ;;  %v1917_v19 = vadd.f32 %v2822_v48, %v1829_v57 }
 0x1b4   :  { %3538 = vst [vmem:[#allocation15_spill] sm:$0xff] %v3424_v51  ;;  %v3430_v50 = vpop.f32.mrf.mxu1 }
 0x1b5   :  { %3540 = vst [vmem:[#allocation17_spill] sm:$0xff] %v3430_v50  ;;  %v3432_v53 = vpop.f32.mrf.mxu0  ;;  %v1912_v17 = vadd.f32 %v2819_v38, %v1824_v45 }
 0x1b6   :  { %v3434_v54 = vpop.f32.mrf.mxu1 }
 0x1b7   :  { %3541 = vst [vmem:[#allocation18_spill] sm:$0xff] %v3434_v54  ;;  %v3436_v59 = vpop.f32.mrf.mxu0 }
 0x1b8   :  { %v3438_v60 = vpop.f32.mrf.mxu1 }
 0x1b9   :  { %3542 = vst [vmem:[#allocation19_spill] sm:$0xff] %v3438_v60  ;;  %v3440_v47 = vpop.f32.mrf.mxu0 }
 0x1ba   :  { %v3442_v56 = vpop.f32.mrf.mxu1 }
 0x1bb   :  { %3543 = vst [vmem:[#allocation20_spill] sm:$0xff] %v3442_v56  ;;  %v3444_v61 = vpop.f32.mrf.mxu0 }
 0x1bc   :  { %v3446_v46 = vpop.f32.mrf.mxu1 }
 0x1bd   :  { %v3448_v58 = vpop.f32.mrf.mxu0 }
 0x1be   :  { %v3450_v0 = vpop.f32.mrf.mxu1 }
 0x1bf   :  { %3544 = vst [vmem:[#allocation21_spill] sm:$0xff] %v3450_v0  ;;  %v2860_v1 = vpop.f32.mrf.mxu0 }
 0x1c0   :  { %v3452_v5 = vpop.f32.mrf.mxu1 }
 0x1c1   :  { %v2861_v6 = vpop.f32.mrf.mxu0 }
 0x1c2   :  { %v3454_v7 = vpop.f32.mrf.mxu1 }
 0x1c3   :  { %v2863_v8 = vpop.f32.mrf.mxu0 }
 0x1c4   :  { %v3456_v2 = vpop.f32.mrf.mxu1 }
 0x1c5   :  { %v2864_v13 = vpop.f32.mrf.mxu0 }
 0x1c6   :  { %v3458_v14 = vpop.f32.mrf.mxu1  ;;  %v2865_v38 = vadd.f32 %v2864_v13, %v2863_v8  ;;  %v2920_v13 = vadd.f32 %v3454_v7, %v3452_v5  ;;  %v3548_v7 = vld [vmem:[#allocation19_spill] sm:$0xff] }
 0x1c7   :  { %v2866_v25 = vpop.f32.mrf.mxu0 }
 0x1c8   :  { %v2924_v26 = vpop.f32.mrf.mxu1 }
 0x1c9   :  { %v2867_v16 = vpop.f32.mrf.mxu0 }
 0x1ca   :  { %v2925_v27 = vpop.f32.mrf.mxu1  ;;  %v2868_v15 = vadd.f32 %v2867_v16, %v2866_v25 }
 0x1cb   :  { %v2869_v28 = vpop.f32.mrf.mxu0 }
 0x1cc   :  { %v2927_v31 = vpop.f32.mrf.mxu1 }
 0x1cd   :  { %v2870_v12 = vpop.f32.mrf.mxu0 }
 0x1ce   :  { %v2928_v20 = vpop.f32.mrf.mxu1  ;;  %v2871_v21 = vadd.f32 %v2870_v12, %v2869_v28 }
 0x1cf   :  { %v2872_v34 = vpop.f32.mrf.mxu0 }
 0x1d0   :  { %v2930_v36 = vpop.f32.mrf.mxu1  ;;  %v1992_v57 = vadd.f32 %v2871_v21, %v3399_v3  ;;  %v2926_v3 = vadd.f32 %v2925_v27, %v2924_v26  ;;  %v3549_v26 = vld [vmem:[#allocation20_spill] sm:$0xff] }
 0x1d1   :  { %v2873_v35 = vpop.f32.mrf.mxu0  ;;  %v2914_v16 = vadd.f32 %v3549_v26, %v3548_v7 }
 0x1d2   :  { %v2931_v39 = vpop.f32.mrf.mxu1  ;;  %v2874_v11 = vadd.f32 %v2873_v35, %v2872_v34  ;;  %v3554_v34 = vld [vmem:[#allocation16_spill] sm:$0xff] }
 0x1d3   :  { %v2875_v29 = vpop.f32.mrf.mxu0  ;;  %v2932_v48 = vadd.f32 %v2931_v39, %v2930_v36 }
 0x1d4   :  { %v2933_v42 = vpop.f32.mrf.mxu1  ;;  %v1997_v18 = vadd.f32 %v2874_v11, %v3406_v9 }
 0x1d5   :  { %v2876_v44 = vpop.f32.mrf.mxu0 }
 0x1d6   :  { %v2934_v40 = vpop.f32.mrf.mxu1  ;;  %v2877_v54 = vadd.f32 %v2876_v44, %v2875_v29  ;;  %v2098_v44 = vlaneseq }
 0x1d7   :  { %v2878_v51 = vpop.f32.mrf.mxu0  ;;  %v2935_v4 = vadd.f32 %v2934_v40, %v2933_v42  ;;  %v2859_v40 = vadd.f32 %v3448_v58, %v3444_v61  ;;  %v3555_v42 = vld [vmem:[#allocation15_spill] sm:$0xff] }
 0x1d8   :  { %v2936_v50 = vpop.f32.mrf.mxu1  ;;  %v2000_v24 = vadd.f32 %v2877_v54, %v1912_v17  ;;  %v2085_v54 = vadd.f32 %v2932_v48, %v1997_v18  ;;  %v2101_v9 = vshrl.u32 %v2098_v44, 7  ;;  %v3158_v17 = vld [vmem:[%s3529_s3] sm:$0xff]  }
 0x1d9   :  { %v2879_v55 = vpop.f32.mrf.mxu0  ;;  %v1976_v58 = vadd.f32 %v2859_v40, %v3378_v33  ;;  %v2099_v33 = vand.u32 127, %v2098_v44  ;;  %3009 = vmatpush3.bf16.msra.mxu1 %v3158_v17 }
 0x1da   :  { %v2880_v63 = vadd.f32 %v2879_v55, %v2878_v51  ;;  %v2937_v56 = vpop.f32.mrf.mxu1  ;;  %v2088_v51 = vadd.f32 %v2935_v4, %v2000_v24  ;;  %v2104_v61 = vadd.s32 1, %v2101_v9  ;;  %v3556_v55 = vld [vmem:[#allocation13_spill] sm:$0xff] }
 0x1db   :  { %v2881_v60 = vpop.f32.mrf.mxu0  ;;  %v2938_v37 = vadd.f32 %v2937_v56, %v2936_v50  ;;  %v2929_v50 = vadd.f32 %v2928_v20, %v2927_v31  ;;  %v1984_v56 = vadd.f32 %v2865_v38, %v3392_v52  ;;  %v2853_v52 = vadd.f32 %v3432_v53, %v3428_v43  ;;  %v3547_v53 = vld [vmem:[#allocation12_spill] sm:$0xff]  ;;  %v3553_v20 = vld [vmem:[#allocation14_spill] sm:$0xff] }
 0x1dc   :  { %v2005_v30 = vadd.f32 %v2880_v63, %v1917_v19  ;;  %v2939_v10 = vpop.f32.mrf.mxu1  ;;  %v3545_v60 = vmov 0.0   ;;  %v2862_v63 = vadd.f32 %v2861_v6, %v2860_v1  ;;  %v2856_v1 = vadd.f32 %v3440_v47, %v3436_v59  ;;  %v3546_v47 = vld [vmem:[#allocation21_spill] sm:$0xff]  ;;  %v2466_v19 = vld [vmem:[%s3528_s2] ss:$0 sm:$0xff]  ;;  %s3237_s2 = smov [#allocation7]  }
 0x1dd   :  { %v2882_v0 = vpop.f32.mrf.mxu0  ;;  %v1989_v10 = vadd.f32 %v2868_v15, %v3396_v62  ;;  %v2923_v6 = vadd.f32 %v3458_v14, %v3456_v2  ;;  %v2917_v2 = vadd.f32 %v3546_v47, %v3446_v46  ;;  %v2102_v43 = vmul.u32 49, %v2101_v9  ;;  %v3552_v46 = vld [vmem:[#allocation18_spill] sm:$0xff]  ;;  %s2327_s3 = sshll.u32 %s3237_s2, 4  ;;  %s2328_s3 = int_to_ptr.vmem [resolvable:$true] %s2327_s3 }
 0x1de   :  { %v2093_v23 = vadd.f32 %v2938_v37, %v2005_v30  ;;  %v2940_v29 = vpop.f32.mrf.mxu1  ;;  %v2080_v0 = vadd.f32 %v2929_v50, %v1992_v57  ;;  %v1981_v62 = vadd.f32 %v2862_v63, %v3385_v41  ;;  %v2850_v41 = vadd.f32 %v3422_v49, %v3417_v32  ;;  %v3551_v49 = vld [vmem:[#allocation17_spill] sm:$0xff]  ;;  %v2469_v37 = vld [vmem:[%s3530_s4] ss:$0 sm:$0xff]  ;;  %s3203_s4 = scalar_lea.vmem %s2328_s3, 32  ;;  %p3208_p11 = scmp.lt.s32.totalorder %s2328_s3, %s2328_s3 }
 0x1df   :  { %v2077_v8 = vadd.f32 %v2926_v3, %v1989_v10  ;;  %v2072_v25 = vadd.f32 %v2923_v6, %v1984_v56  ;;  %v1973_v59 = vadd.f32 %v2856_v1, %v3371_v22  ;;  %v1968_v5 = vadd.f32 %v2853_v52, %v3547_v53  ;;  %v3550_v22 = vld [vmem:[#allocation11_spill] sm:$0xff]  ;;  %p3204_p10 = scmp.ne.s32.totalorder %s2328_s3, %s3203_s4  ;;  %p3209_p12 = scmp.lt.s32.totalorder %s3203_s4, %s3203_s4 }
 0x1e0   :  { %2966 = vmatpush3.msk.msra.mxu0 %vm2121_vm1, %v2093_v23  ;;  %v2069_v14 = vadd.f32 %v2920_v13, %v1981_v62  ;;  %v2064_v27 = vadd.f32 %v2917_v2, %v1976_v58  ;;  %v2105_v28 = vmul.u32 49, %v2104_v61  ;;  %v1965_v32 = vadd.f32 %v2850_v41, %v3550_v22 }
 0x1e1   :  { %2967 = vmatprep.subr.mxu0 %v3545_v60  ;;  %v2911_v31 = vadd.f32 %v3552_v46, %v3551_v49  ;;  %v2061_v12 = vadd.f32 %v2914_v16, %v1973_v59  ;;  %v2908_v36 = vadd.f32 %v3554_v34, %v3553_v20  ;;  %vm2103_vm2 = vcmp.ge.s32.totalorder %v2099_v33, %v2102_v43  ;;  %p3210_p13 = por %p3209_p12, %p3208_p11 }
 0x1e2   :  { %2968 = vmatpush3.msra.mxu0 %v2088_v51  ;;  %vm2106_vm3 = vcmp.lt.s32.totalorder %v2099_v33, %v2105_v28 }
 0x1e3   :  { %2969 = vmatprep.subr.mxu0 %v3545_v60  ;;  %v2056_v35 = vadd.f32 %v2911_v31, %v1968_v5  ;;  %v2053_v39 = vadd.f32 %v2908_v36, %v1965_v32  ;;  %vm2107_vm4 = vmand %vm2103_vm2, %vm2106_vm3  ;;  %p3211_p0 = pnand %p3210_p13, %p3204_p10 }
 0x1e4   :  { %2970 = vmatpush3.msra.mxu0 %v2085_v54  ;;  %v2465_v45 = vsel %vm2107_vm4, 1.0, %v3545_v60 }
 0x1e5   :  { %2971 = vmatprep.subr.mxu0 %v3545_v60 }
 0x1e6   :  { %2972 = vmatpush3.msra.mxu0 %v2080_v0 }
 0x1e7   :  { %2973 = vmatprep.subr.mxu0 %v3545_v60 }
 0x1e8   :  { %2974 = vmatpush3.msra.mxu0 %v2077_v8 }
 0x1e9   :  { %2975 = vmatprep.subr.mxu0 %v3545_v60 }
 0x1ea   :  { %2976 = vmatpush3.msra.mxu0 %v2072_v25 }
 0x1eb   :  { %2977 = vmatprep.subr.mxu0 %v3545_v60 }
 0x1ec   :  { %2978 = vmatpush3.msra.mxu0 %v2069_v14 }
 0x1ed   :  { %2979 = vmatprep.subr.mxu0 %v3545_v60 }
 0x1ee   :  { %2980 = vmatpush3.msra.mxu0 %v2064_v27 }
 0x1ef   :  { %2981 = vmatprep.subr.mxu0 %v3545_v60 }
 0x1f0   :  { %2982 = vmatpush3.msra.mxu0 %v2061_v12 }
 0x1f1   :  { %2983 = vmatprep.subr.mxu0 %v3545_v60 }
 0x1f2   :  { %2984 = vmatpush3.msra.mxu0 %v2056_v35 }
 0x1f3   :  { %2985 = vmatprep.subr.mxu0 %v3545_v60 }
 0x1f4   :  { %2986 = vmatpush3.msra.mxu0 %v2053_v39 }
 0x1f5   :  { %2987 = vmatprep.subr.mxu0 %v3545_v60 }
 0x1f6   :  { %2988 = vmatpush3.msra.mxu0 %v3555_v42 }
 0x1f7   :  { %2989 = vmatprep.subr.mxu0 %v3545_v60 }
 0x1f8   :  { %2990 = vmatpush3.msra.mxu0 %v3556_v55 }
 0x1f9   :  { %2992 = vmatmul.mubr.msk.f32.vlgmr.msra.gmra.mxu0 %vm2117_vm5, %v2465_v45 }
 0x2b9   :  { %v2191_v11 = vpop.f32.mrf.mxu0 }
 0x2ba   :  { %v2192_v21 = vadd.f32 %v2466_v19, %v2191_v11 }
 0x2bb   :  { %v2993_v24 = vpop.f32.mrf.mxu0 }
 0x2bc   :  { %v2195_v30 = vpack.c.bf16 %v2192_v21, %v2192_v21 }
 0x2be   :  { %3011 = vmatmul.mubr.bf16.vlgmr.msra.gmra.mxu1 %v2195_v30 }
 0x37e   :  { %v2301_v15 = vpop.f32.mrf.mxu1 }
 0x37f   :  { %v2302_v18 = vadd.f32 %v2469_v37, %v2301_v15 }
 0x380   :  { %v3012_v4 = vpop.f32.mrf.mxu1 }
 0x381   :  { %v2308_v23 = vsel %vm2307_vm6, %v2302_v18, -inf }
 0x382   :  { %2309 = vmax.xlane.f32.xlu0 %v2308_v23  ;;  %v2304_v29 = vpop.f32.mrf.mxu1 }
 0x384   :  { %v3013_v44 = vpop.f32.mrf.mxu1 }
 0x40b   :  { %v2310_v38 = vpop.xlane.xlu0 %2309 }
 0x40c   :  { %v2311_v57 = vsub.f32 %v2302_v18, %v2310_v38 }
 0x40e   :  { %v2312_v48 = vmul.f32 1.442695, %v2311_v57 }
 0x410   :  { %3159 = vpow2.f32 %v2312_v48 }
 0x41d   :  { %v3160_v51 = vpop.eup %3159 }
 0x41e   :  { %v2314_v60 = vsel %vm2307_vm6, %v3160_v51, 0.0 }
 0x41f   :  { %2315 = vadd.xlane.f32.xlu0 %v2314_v60 }
 0x4a8   :  { %v2316_v63 = vpop.xlane.xlu0 %2315 }
 0x4a9   :  { %3161 = vlog2.f32 %v2316_v63 }
 0x4b6   :  { %v3162_v10 = vpop.eup %3161 }
 0x4b7   :  { %v2318_v50 = vmul.f32 0.6931472, %v3162_v10 }
 0x4b9   :  { %v2319_v54 = vsub.f32 %v2311_v57, %v2318_v50 }
 0x4bb   :  { %2320 = vst.msk [vmem:[#allocation7] sm:$0x3] %vm2307_vm6, %v2319_v54 }
 0x4bc   :  { %3214 = shalt.err (!%p3211_p0)
}
 0x4bd   :  { %2330 = dma.vmem_to_hbm [thread:$0]  %s2328_s3, 32, %s3531_s5, [#allocation4]  }
 0x4be   :  { %3227 = dma.done.wait [#allocation4], 32  }
 0x4bf   :  { %3228 = vsyncadd [#allocation4], 4294967264 }
 0x4c0   :  { %2334 = vsyncpa [#allocation3], 1 }
 0x4c1   :  { %2335 = vsyncpa [#allocation6], 1 }
 0x4c2   :  { %2336 = vsyncpa [#allocation4], 1 }

</bundles_post_ra>
